<compile_context>
chip_gen: v5e
topology: v5e:2x2
jax: 0.10.0
libtpu: 0.0.40
codegen_flags: <defaults>
</compile_context>

<pallas_src>
import jax
import jax.numpy as jnp
from jax.experimental import pallas as pl
from jax.experimental.pallas import tpu as pltpu

# OGB full_bond_feature_dims (bond type, bond stereo, is-conjugated)
FULL_BOND_FEATURE_DIMS = (5, 6, 2)
_KB = 16  # concatenated bond table rows (13 real rows, padded to 16)


def _gnn_kernel(x_ref, w_ref, src_ref, tgt_ref, ef_ref, out_ref, xwt_ref):
    eb = pl.program_id(0)
    NT = xwt_ref.shape[0]        # n_pad + _KB
    NP = out_ref.shape[0]        # n_pad
    ET = src_ref.shape[0]        # edge tile

    # --- once: one MXU pass builds BOTH the transformed node features and the
    #     bond table ([x@W ; bond_tbl]); kept resident in bf16 VMEM scratch.
    #     Also zero the resident output accumulator.
    @pl.when(eb == 0)
    def _init():
        xwt_ref[...] = jnp.dot(
            x_ref[...], w_ref[...], preferred_element_type=jnp.float32
        ).astype(jnp.bfloat16)
        out_ref[...] = jnp.zeros_like(out_ref)

    # --- fused gather + BondEncoder: a single multi-hot (ET, NT) @ (NT, Dp)
    #     matmul. Columns 0..NP-1 select xw[src]; columns NP.. select bond
    #     embedding rows (edge features pre-offset in the wrapper; all index
    #     ranges are disjoint, padded edges carry -1 and select nothing).
    iota = jax.lax.broadcasted_iota(jnp.int32, (ET, NT), 1)
    ef = ef_ref[...]                                                 # (ET, 3)
    oh = ((src_ref[...] == iota)
          | (ef[:, 0:1] == iota)
          | (ef[:, 1:2] == iota)
          | (ef[:, 2:3] == iota)).astype(jnp.bfloat16)               # (ET, NT)
    msg = jnp.dot(oh, xwt_ref[...],
                  preferred_element_type=jnp.float32).astype(jnp.bfloat16)

    # --- scatter-add to targets as a standard (NP, ET) @ (ET, Dp) MXU matmul,
    #     one-hot built natively in (NP, ET) orientation from the lane-dense
    #     target row just before use (short live range).
    tgt_iota = jax.lax.broadcasted_iota(jnp.int32, (NP, ET), 0)
    tgt_oh = (tgt_ref[...] == tgt_iota).astype(jnp.bfloat16)         # (NP, ET)
    out_ref[...] += jnp.dot(tgt_oh, msg, preferred_element_type=jnp.float32)


def general_ogb_conv(x, edge_index, edge_feature, weight, emb_tables, *, edge_tile=128):
    N, din = x.shape
    dout = weight.shape[1]
    E = edge_index.shape[0]

    # Padded sizes: lane-dense output width, 16-sublane node rows (bf16 packing).
    dp = -(-dout // 128) * 128
    n_pad = -(-N // 16) * 16
    din_p = -(-din // 8) * 8
    din_aug = din_p + _KB
    nt = n_pad + _KB

    n_blocks = max(1, -(-E // edge_tile))
    e_pad = n_blocks * edge_tile

    # Augmented operands so a single matmul yields [x @ W ; bond_table]:
    #   x_aug = [[x, 0], [0, I_KB]],  w_aug = [[W_pad], [bond_tbl]].
    x_aug = jnp.zeros((nt, din_aug), jnp.float32)
    x_aug = x_aug.at[:N, :din].set(x.astype(jnp.float32))
    x_aug = x_aug.at[n_pad:, din_p:].set(jnp.eye(_KB, dtype=jnp.float32))

    w_aug = jnp.zeros((din_aug, dp), jnp.float32)
    w_aug = w_aug.at[:din, :dout].set(weight.astype(jnp.float32))
    offsets = []
    off = 0
    for t in emb_tables:
        offsets.append(off)
        w_aug = w_aug.at[din_p + off: din_p + off + t.shape[0], :dout].set(
            t.astype(jnp.float32))
        off += t.shape[0]
    offsets = jnp.asarray(offsets, jnp.int32)                        # (3,) = (0, 5, 11)

    # Index layouts: src edge-on-sublane (E,1), tgt lane-dense (1,E), features
    # edge-on-sublane (E,3) pre-offset to the bond-table column range.
    # Padded edges get -1 sentinels -> all-zero one-hot rows/columns.
    src = edge_index[:, 0].astype(jnp.int32)
    tgt = edge_index[:, 1].astype(jnp.int32)
    ef_off = edge_feature.astype(jnp.int32) + (n_pad + offsets)[None, :]   # (E, 3)

    pad_e = e_pad - E
    src_col = jnp.pad(src, (0, pad_e), constant_values=-1)[:, None]        # (e_pad, 1)
    tgt_row = jnp.pad(tgt, (0, pad_e), constant_values=-1)[None, :]        # (1, e_pad)
    ef_pad = jnp.pad(ef_off, ((0, pad_e), (0, 0)), constant_values=-1)     # (e_pad, 3)

    out = pl.pallas_call(
        _gnn_kernel,
        out_shape=jax.ShapeDtypeStruct((n_pad, dp), jnp.float32),
        grid_spec=pltpu.PrefetchScalarGridSpec(
            num_scalar_prefetch=0,
            grid=(n_blocks,),
            in_specs=[
                pl.BlockSpec((nt, din_aug), lambda e: (0, 0)),       # x_aug   (resident)
                pl.BlockSpec((din_aug, dp), lambda e: (0, 0)),       # w_aug   (resident)
                pl.BlockSpec((edge_tile, 1), lambda e: (e, 0)),      # src indices
                pl.BlockSpec((1, edge_tile), lambda e: (0, e)),      # tgt indices (lane-dense)
                pl.BlockSpec((edge_tile, 3), lambda e: (e, 0)),      # bond features (offset)
            ],
            out_specs=pl.BlockSpec((n_pad, dp), lambda e: (0, 0)),   # resident accumulator
            scratch_shapes=[pltpu.VMEM((nt, dp), jnp.bfloat16)],     # [xw ; bond_tbl]
        ),
        compiler_params=pltpu.CompilerParams(
            dimension_semantics=("arbitrary",),                      # edge axis accumulates
        ),
    )(x_aug, w_aug, src_col, tgt_row, ef_pad)

    return out[:N, :dout]


def _reference(x, edge_index, edge_feature, weight, emb_tables):
    xw = x @ weight
    bond = sum(emb_tables[k][edge_feature[:, k]] for k in range(len(emb_tables)))
    msg = xw[edge_index[:, 0]] + bond
    return jax.ops.segment_sum(msg, edge_index[:, 1], num_segments=x.shape[0])


if __name__ == "__main__":
    key = jax.random.PRNGKey(0)
    N, E, DIN, DOUT = 128, 200, 32, 64

    k_x, k_w, k_src, k_tgt, k_ef, k_e0, k_e1, k_e2 = jax.random.split(key, 8)

    x = jax.random.normal(k_x, (N, DIN), dtype=jnp.float32)

    # glorot init for the weight
    limit_w = (6.0 / (DIN + DOUT)) ** 0.5
    weight = jax.random.uniform(k_w, (DIN, DOUT), jnp.float32, -limit_w, limit_w)

    # xavier-uniform-initialized bond embedding tables
    emb_tables = []
    for k_emb, dim in zip((k_e0, k_e1, k_e2), FULL_BOND_FEATURE_DIMS):
        lim = (6.0 / (dim + DOUT)) ** 0.5
        emb_tables.append(jax.random.uniform(k_emb, (dim, DOUT), jnp.float32, -lim, lim))
    emb_tables = tuple(emb_tables)

    src = jax.random.randint(k_src, (E, 1), 0, N, dtype=jnp.int32)
    tgt = jax.random.randint(k_tgt, (E, 1), 0, N, dtype=jnp.int32)
    edge_index = jnp.concatenate([src, tgt], axis=1)          # (E, 2)

    edge_feature = jnp.stack(
        [jax.random.randint(jax.random.fold_in(k_ef, k), (E,), 0, d, dtype=jnp.int32)
         for k, d in enumerate(FULL_BOND_FEATURE_DIMS)],
        axis=1,
    )                                                         # (E, 3)

    out = general_ogb_conv(x, edge_index, edge_feature, weight, emb_tables, edge_tile=128)
    out = jax.block_until_ready(out)

    ref = _reference(x, edge_index, edge_feature, weight, emb_tables)
    assert out.shape == (N, DOUT)
    # bf16 matmul operands with f32 accumulation: tolerance reflects bf16
    # rounding of xw / bond table / msg; structural errors would be O(1).
    assert jnp.allclose(out, ref, atol=5e-2, rtol=5e-2), "mismatch vs JAX reference"

    print("KERNEL_OK")
</pallas_src>

<mosaic_0001>
module attributes {stable_mosaic.version = 11 : i64} {
  func.func @_gnn_kernel(%arg0: i32, %arg1: memref<144x48xf32, #tpu.memory_space<vmem>>, %arg2: memref<48x128xf32, #tpu.memory_space<vmem>>, %arg3: memref<128x1xi32, #tpu.memory_space<vmem>>, %arg4: memref<1x128xi32, #tpu.memory_space<vmem>>, %arg5: memref<128x3xi32, #tpu.memory_space<vmem>>, %arg6: memref<128x128xf32, #tpu.memory_space<vmem>>, %arg7: memref<144x128xbf16, #tpu.memory_space<vmem>>) attributes {dimension_semantics = [#tpu.dimension_semantics<arbitrary>], iteration_bounds = array<i64: 2>, scalar_prefetch = 0 : i64, scratch_operands = 1 : i64, tpu.core_type = #tpu.core_type<tc>, window_params = [{pipeline_mode = #tpu.pipeline_mode<synchronous>, transform_indices = @transform_0, window_bounds = array<i64: 144, 48>}, {pipeline_mode = #tpu.pipeline_mode<synchronous>, transform_indices = @transform_1, window_bounds = array<i64: 48, 128>}, {transform_indices = @transform_2, window_bounds = array<i64: 128, 1>}, {transform_indices = @transform_3, window_bounds = array<i64: 1, 128>}, {transform_indices = @transform_4, window_bounds = array<i64: 128, 3>}, {pipeline_mode = #tpu.pipeline_mode<synchronous>, transform_indices = @transform_5, window_bounds = array<i64: 128, 128>}]} {
    %c0_i32 = arith.constant 0 : i32
    %0 = arith.cmpi eq, %arg0, %c0_i32 : i32
    %1 = arith.extui %0 : i1 to i32
    %c0_i32_0 = arith.constant 0 : i32
    %2 = arith.cmpi ne, %1, %c0_i32_0 : i32
    scf.if %2 {
      %c0_13 = arith.constant 0 : index
      %c0_14 = arith.constant 0 : index
      %37 = vector.load %arg1[%c0_13, %c0_14] : memref<144x48xf32, #tpu.memory_space<vmem>>, vector<144x48xf32>
      %c0_15 = arith.constant 0 : index
      %c0_16 = arith.constant 0 : index
      %38 = vector.load %arg2[%c0_15, %c0_16] : memref<48x128xf32, #tpu.memory_space<vmem>>, vector<48x128xf32>
      %cst_17 = arith.constant dense<0.000000e+00> : vector<144x128xf32>
      %39 = tpu.matmul %37, %38, %cst_17 {dimension_numbers = #tpu.dot_dimension_numbers<[1], [0], [0], [1], [0, 0, 1, 1], [], []>} : vector<144x48xf32>, vector<48x128xf32>, vector<144x128xf32> -> vector<144x128xf32>
      %40 = arith.truncf %39 : vector<144x128xf32> to vector<144x128xbf16>
      %c0_18 = arith.constant 0 : index
      %c0_19 = arith.constant 0 : index
      %41 = vector.load %arg7[%c0_18, %c0_19] : memref<144x128xbf16, #tpu.memory_space<vmem>>, vector<144x128xbf16>
      tpu.vector_store %arg7[%c0_18, %c0_19], %40 {strides = array<i32>} : memref<144x128xbf16, #tpu.memory_space<vmem>>, vector<144x128xbf16>,
      %cst_20 = arith.constant 0.000000e+00 : f32
      %42 = vector.broadcast %cst_20 : f32 to vector<128x128xf32>
      %c0_21 = arith.constant 0 : index
      %c0_22 = arith.constant 0 : index
      %43 = vector.load %arg6[%c0_21, %c0_22] : memref<128x128xf32, #tpu.memory_space<vmem>>, vector<128x128xf32>
      tpu.vector_store %arg6[%c0_21, %c0_22], %42 {strides = array<i32>} : memref<128x128xf32, #tpu.memory_space<vmem>>, vector<128x128xf32>,
    } else {
    }
    %3 = tpu.iota {dimensions = array<i32: 1>} : vector<128x144xi32>
    %c0 = arith.constant 0 : index
    %c0_1 = arith.constant 0 : index
    %4 = vector.load %arg5[%c0, %c0_1] : memref<128x3xi32, #tpu.memory_space<vmem>>, vector<128x3xi32>
    %c0_2 = arith.constant 0 : index
    %c0_3 = arith.constant 0 : index
    %5 = vector.load %arg3[%c0_2, %c0_3] : memref<128x1xi32, #tpu.memory_space<vmem>>, vector<128x1xi32>
    %6 = vector.broadcast %5 : vector<128x1xi32> to vector<128x144xi32>
    %7 = arith.cmpi eq, %6, %3 : vector<128x144xi32>
    %8 = vector.extract_strided_slice %4 {offsets = [0, 0], sizes = [128, 1], strides = [1, 1]} : vector<128x3xi32> to vector<128x1xi32>
    %9 = vector.broadcast %8 : vector<128x1xi32> to vector<128x144xi32>
    %10 = arith.cmpi eq, %9, %3 : vector<128x144xi32>
    %11 = arith.ori %7, %10 : vector<128x144xi1>
    %12 = vector.extract_strided_slice %4 {offsets = [0, 1], sizes = [128, 1], strides = [1, 1]} : vector<128x3xi32> to vector<128x1xi32>
    %13 = vector.broadcast %12 : vector<128x1xi32> to vector<128x144xi32>
    %14 = arith.cmpi eq, %13, %3 : vector<128x144xi32>
    %15 = arith.ori %11, %14 : vector<128x144xi1>
    %16 = vector.extract_strided_slice %4 {offsets = [0, 2], sizes = [128, 1], strides = [1, 1]} : vector<128x3xi32> to vector<128x1xi32>
    %17 = vector.broadcast %16 : vector<128x1xi32> to vector<128x144xi32>
    %18 = arith.cmpi eq, %17, %3 : vector<128x144xi32>
    %19 = arith.ori %15, %18 : vector<128x144xi1>
    %20 = arith.extui %19 : vector<128x144xi1> to vector<128x144xi32>
    %21 = arith.sitofp %20 : vector<128x144xi32> to vector<128x144xf32>
    %22 = arith.truncf %21 : vector<128x144xf32> to vector<128x144xbf16>
    %c0_4 = arith.constant 0 : index
    %c0_5 = arith.constant 0 : index
    %23 = vector.load %arg7[%c0_4, %c0_5] : memref<144x128xbf16, #tpu.memory_space<vmem>>, vector<144x128xbf16>
    %cst = arith.constant dense<0.000000e+00> : vector<128x128xf32>
    %24 = tpu.matmul %22, %23, %cst {dimension_numbers = #tpu.dot_dimension_numbers<[1], [0], [0], [1], [0, 0, 1, 1], [], []>} : vector<128x144xbf16>, vector<144x128xbf16>, vector<128x128xf32> -> vector<128x128xf32>
    %25 = arith.truncf %24 : vector<128x128xf32> to vector<128x128xbf16>
    %26 = tpu.iota {dimensions = array<i32: 0>} : vector<128x128xi32>
    %c0_6 = arith.constant 0 : index
    %c0_7 = arith.constant 0 : index
    %27 = vector.load %arg4[%c0_6, %c0_7] : memref<1x128xi32, #tpu.memory_space<vmem>>, vector<1x128xi32>
    %28 = vector.broadcast %27 : vector<1x128xi32> to vector<128x128xi32>
    %29 = arith.cmpi eq, %28, %26 : vector<128x128xi32>
    %30 = arith.extui %29 : vector<128x128xi1> to vector<128x128xi32>
    %31 = arith.sitofp %30 : vector<128x128xi32> to vector<128x128xf32>
    %32 = arith.truncf %31 : vector<128x128xf32> to vector<128x128xbf16>
    %c0_8 = arith.constant 0 : index
    %c0_9 = arith.constant 0 : index
    %33 = vector.load %arg6[%c0_8, %c0_9] : memref<128x128xf32, #tpu.memory_space<vmem>>, vector<128x128xf32>
    %cst_10 = arith.constant dense<0.000000e+00> : vector<128x128xf32>
    %34 = tpu.matmul %32, %25, %cst_10 {dimension_numbers = #tpu.dot_dimension_numbers<[1], [0], [0], [1], [0, 0, 1, 1], [], []>} : vector<128x128xbf16>, vector<128x128xbf16>, vector<128x128xf32> -> vector<128x128xf32>
    %35 = arith.addf %33, %34 : vector<128x128xf32>
    %c0_11 = arith.constant 0 : index
    %c0_12 = arith.constant 0 : index
    %36 = vector.load %arg6[%c0_11, %c0_12] : memref<128x128xf32, #tpu.memory_space<vmem>>, vector<128x128xf32>
    tpu.vector_store %arg6[%c0_11, %c0_12], %35 {strides = array<i32>} : memref<128x128xf32, #tpu.memory_space<vmem>>, vector<128x128xf32>,
    return
  }
  func.func @transform_0(%arg0: i32) -> (i32, i32) {
    %c0_i32 = arith.constant 0 : i32
    %c0_i32_0 = arith.constant 0 : i32
    %c0_i32_1 = arith.constant 0 : i32
    return %c0_i32, %c0_i32_0 : i32, i32
  }
  func.func @transform_1(%arg0: i32) -> (i32, i32) {
    %c0_i32 = arith.constant 0 : i32
    %c0_i32_0 = arith.constant 0 : i32
    %c0_i32_1 = arith.constant 0 : i32
    return %c0_i32, %c0_i32_0 : i32, i32
  }
  func.func @transform_2(%arg0: i32) -> (i32, i32) {
    %c0_i32 = arith.constant 0 : i32
    %c0_i32_0 = arith.constant 0 : i32
    return %arg0, %c0_i32 : i32, i32
  }
  func.func @transform_3(%arg0: i32) -> (i32, i32) {
    %c0_i32 = arith.constant 0 : i32
    %c0_i32_0 = arith.constant 0 : i32
    return %c0_i32, %arg0 : i32, i32
  }
  func.func @transform_4(%arg0: i32) -> (i32, i32) {
    %c0_i32 = arith.constant 0 : i32
    %c0_i32_0 = arith.constant 0 : i32
    return %arg0, %c0_i32 : i32, i32
  }
  func.func @transform_5(%arg0: i32) -> (i32, i32) {
    %c0_i32 = arith.constant 0 : i32
    %c0_i32_0 = arith.constant 0 : i32
    %c0_i32_1 = arith.constant 0 : i32
    return %c0_i32, %c0_i32_0 : i32, i32
  }
}

</mosaic_0001>

<bundles_post_ra>
// kernel: tpu_custom_call.1
= control target key start
LH: loop header
LB: loop body
LE: loop exit
PB: predicated region body
PF: predicated region fallthrough
CT: control target
= control target key end

     0   :  { %10 = vsyncpa [#allocation4], 0  ;;  %s1835_s18 = smov 0   ;;  %s2372_s0 = inlined_call_operand.vmem [shape: f32[144,48], index: 0, kind: input, shape index: {}]   ;;  %s2373_s1 = inlined_call_operand.vmem [shape: f32[48,128], index: 1, kind: input, shape index: {}]   ;;  %s2374_s2 = inlined_call_operand.vmem [shape: s32[256,1], index: 2, kind: input, shape index: {}]   ;;  %s2375_s3 = inlined_call_operand.vmem [shape: s32[1,256], index: 3, kind: input, shape index: {}]   ;;  %s2376_s4 = inlined_call_operand.vmem [shape: s32[256,3], index: 4, kind: input, shape index: {}]   ;;  %s2377_s5 = inlined_call_operand.hbm [shape: f32[128,128], index: 5, kind: output, shape index: {}]  }
   0x1 LB: > { %s1841_s19 = sadd.s32 4294967295, %s1794_s18   ;;  %p1436_p0 = scmp.ge.s32.totalorder %s1794_s18, 1  ;;  %s1794_s18 = sphi %s1835_s18, %s16_s18  }
   0x2   : > { %p203_p1 = scmp.lt.s32.totalorder %s1794_s18, 3 }
   0x4   : > { %p204_p2 = pnand %p1436_p0, %p203_p1 }
   0x5   : > { %s1437_s20 = sshll.u32 (!%p204_p2), %s1841_s19, 4  ;;  %p240_p3 = scmp.lt.s32.totalorder (!%p204_p2), %s1841_s19, 1 }
   0x6   : > { %207 = sbr.rel (%p204_p2) target bundleno = 927 (0x39f), region = 40  ;;  %p235_p4 = scmp.lt.s32.totalorder (!%p204_p2), %s1437_s20, 31 }
   0x7   : > { %p1441_p5 = scmp.ne.s32.totalorder (!%p204_p2), %s1841_s19, 0 }
   0xb   : > { %s1848_s21 = scalar_select %p240_p3, %s1841_s19, 1 }
   0xc   : > { %s2407_s20 = smov (!%p235_p4, %s1437_s20), 31  ;;  %253 = sbr.rel (%p1441_p5) target bundleno = 197 (0xc5), region = 44 }
   0xd   : > { %s242_s24 = scalar_lea.vmem %s2375_s3, %s1848_s21  ;;  %s1438_s25 = sshll.u32 %s2407_s20, 3 }
   0xe   : > { %s1857_s28 = scalar_lea.vmem %s2374_s2, %s1438_s25  ;;  %s1862_s6 = scalar_lea.vmem %s2376_s4, %s1438_s25 }
  0x11   : > { %v277_v0 = vld [vmem:[%s2373_s1 + $0x28] sm:$0xff]  ;;  %v276_v1 = vld [vmem:[%s2373_s1 + $0x20] sm:$0xff]  ;;  %v275_v2 = vld [vmem:[%s2373_s1 + $0x18] sm:$0xff]  ;;  %vm278_vm0 = vcmask 392192   ;;  %v1796_v30 = vmov 0.0  }
  0x12   : > { %1650 = vmatpush.msra.mxu1 %v277_v0  ;;  %1651 = vmatpush.msra.mxu2 %v277_v0  ;;  %v274_v3 = vld [vmem:[%s2373_s1 + $0x10] sm:$0xff]  ;;  %v273_v4 = vld [vmem:[%s2373_s1 + $0x8] sm:$0xff]  ;;  %v272_v5 = vld [vmem:[%s2373_s1] sm:$0xff]  ;;  %440 = vst [vmem:[#allocation3] sm:$0xff] %v1796_v30 }
  0x13   : > { %1652 = vmatpush.msra.mxu3 %v277_v0  ;;  %343 = vmatpush.msra.mxu0 %v277_v0  ;;  %v258_v6 = vld [vmem:[%s2372_s0 + $0x20] sm:$0xff]  ;;  %v263_v7 = vld [vmem:[%s2372_s0 + $0x48] sm:$0xff]  ;;  %v268_v8 = vld [vmem:[%s2372_s0 + $0x70] sm:$0xff]  ;;  %441 = vst [vmem:[#allocation3 + $0x8] sm:$0xff] %v1796_v30 }
  0x14   : > { %1653 = vmatpush.msra.mxu1 %v276_v1  ;;  %1654 = vmatpush.msra.mxu2 %v276_v1  ;;  %v254_v9 = vld [vmem:[%s2372_s0] sm:$0xff]  ;;  %v259_v10 = vld [vmem:[%s2372_s0 + $0x28] sm:$0xff]  ;;  %v264_v11 = vld [vmem:[%s2372_s0 + $0x50] sm:$0xff]  ;;  %442 = vst [vmem:[#allocation3 + $0x10] sm:$0xff] %v1796_v30 }
  0x15   : > { %1655 = vmatpush.msra.mxu3 %v276_v1  ;;  %344 = vmatpush.msra.mxu0 %v276_v1  ;;  %v269_v12 = vld [vmem:[%s2372_s0 + $0x78] sm:$0xff]  ;;  %v255_v13 = vld [vmem:[%s2372_s0 + $0x8] sm:$0xff]  ;;  %v260_v14 = vld [vmem:[%s2372_s0 + $0x30] sm:$0xff]  ;;  %443 = vst [vmem:[#allocation3 + $0x18] sm:$0xff] %v1796_v30 }
  0x16   : > { %1656 = vmatpush.msra.mxu1 %v275_v2  ;;  %1657 = vmatpush.msra.mxu2 %v275_v2  ;;  %v265_v15 = vld [vmem:[%s2372_s0 + $0x58] sm:$0xff]  ;;  %v270_v16 = vld [vmem:[%s2372_s0 + $0x80] sm:$0xff]  ;;  %v256_v17 = vld [vmem:[%s2372_s0 + $0x10] sm:$0xff]  ;;  %444 = vst [vmem:[#allocation3 + $0x20] sm:$0xff] %v1796_v30 }
  0x17   : > { %1658 = vmatpush.msra.mxu3 %v275_v2  ;;  %345 = vmatpush.msra.mxu0 %v275_v2  ;;  %v261_v18 = vld [vmem:[%s2372_s0 + $0x38] sm:$0xff]  ;;  %v266_v19 = vld [vmem:[%s2372_s0 + $0x60] sm:$0xff]  ;;  %v271_v20 = vld [vmem:[%s2372_s0 + $0x88] sm:$0xff]  ;;  %445 = vst [vmem:[#allocation3 + $0x28] sm:$0xff] %v1796_v30 }
  0x18   : > { %1659 = vmatpush.msra.mxu1 %v274_v3  ;;  %1660 = vmatpush.msra.mxu2 %v274_v3  ;;  %v257_v21 = vld [vmem:[%s2372_s0 + $0x18] sm:$0xff]  ;;  %v262_v22 = vld [vmem:[%s2372_s0 + $0x40] sm:$0xff]  ;;  %v267_v23 = vld [vmem:[%s2372_s0 + $0x68] sm:$0xff]  ;;  %446 = vst [vmem:[#allocation3 + $0x30] sm:$0xff] %v1796_v30 }
  0x19   : > { %1661 = vmatpush.msra.mxu3 %v274_v3  ;;  %346 = vmatpush.msra.mxu0 %v274_v3  ;;  %447 = vst [vmem:[#allocation3 + $0x38] sm:$0xff] %v1796_v30 }
  0x1a   : > { %1662 = vmatpush.msra.mxu1 %v273_v4  ;;  %1663 = vmatpush.msra.mxu2 %v273_v4  ;;  %448 = vst [vmem:[#allocation3 + $0x40] sm:$0xff] %v1796_v30 }
  0x1b   : > { %1664 = vmatpush.msra.mxu3 %v273_v4  ;;  %347 = vmatpush.msra.mxu0 %v273_v4  ;;  %449 = vst [vmem:[#allocation3 + $0x48] sm:$0xff] %v1796_v30 }
  0x1c   : > { %1665 = vmatpush.msra.mxu1 %v272_v5  ;;  %1666 = vmatpush.msra.mxu2 %v272_v5  ;;  %450 = vst [vmem:[#allocation3 + $0x50] sm:$0xff] %v1796_v30 }
  0x1d   : > { %1667 = vmatpush.msra.mxu3 %v272_v5  ;;  %1446 = vmatmul.msk.f32.vlgmr.msra.gmra.mxu1 %vm278_vm0, %v258_v6  ;;  %451 = vst [vmem:[#allocation3 + $0x58] sm:$0xff] %v1796_v30 }
  0x1e   : > { %1451 = vmatmul.msk.f32.vlgmr.msra.gmra.mxu2 %vm278_vm0, %v263_v7  ;;  %1456 = vmatmul.msk.f32.vlgmr.msra.gmra.mxu3 %vm278_vm0, %v268_v8  ;;  %452 = vst [vmem:[#allocation3 + $0x60] sm:$0xff] %v1796_v30 }
  0x1f   : > { %348 = vmatpush.msra.mxu0 %v272_v5  ;;  %453 = vst [vmem:[#allocation3 + $0x68] sm:$0xff] %v1796_v30 }
  0x20   : > { %1442 = vmatmul.msk.f32.vlgmr.msra.gmra.mxu0 %vm278_vm0, %v254_v9  ;;  %454 = vst [vmem:[#allocation3 + $0x70] sm:$0xff] %v1796_v30 }
  0x21   : > { %455 = vst [vmem:[#allocation3 + $0x78] sm:$0xff] %v1796_v30 }
  0x25   : > { %1447 = vmatmul.msk.f32.gmra.mxu1 %vm278_vm0, %v259_v10 }
  0x26   : > { %1452 = vmatmul.msk.f32.gmra.mxu2 %vm278_vm0, %v264_v11  ;;  %1457 = vmatmul.msk.f32.gmra.mxu3 %vm278_vm0, %v269_v12 }
  0x28   : > { %1443 = vmatmul.msk.f32.gmra.mxu0 %vm278_vm0, %v255_v13 }
  0x2d   : > { %1448 = vmatmul.msk.f32.gmra.mxu1 %vm278_vm0, %v260_v14 }
  0x2e   : > { %1453 = vmatmul.msk.f32.gmra.mxu2 %vm278_vm0, %v265_v15  ;;  %1458 = vmatmul.msk.f32.gmra.mxu3 %vm278_vm0, %v270_v16 }
  0x30   : > { %1444 = vmatmul.msk.f32.gmra.mxu0 %vm278_vm0, %v256_v17 }
  0x35   : > { %1449 = vmatmul.msk.f32.gmra.mxu1 %vm278_vm0, %v261_v18 }
  0x36   : > { %1454 = vmatmul.msk.f32.gmra.mxu2 %vm278_vm0, %v266_v19  ;;  %1459 = vmatmul.msk.f32.gmra.mxu3 %vm278_vm0, %v271_v20 }
  0x38   : > { %1445 = vmatmul.msk.f32.gmra.mxu0 %vm278_vm0, %v257_v21 }
  0x3d   : > { %1450 = vmatmul.msk.f32.gmra.mxu1 %vm278_vm0, %v262_v22 }
  0x3e   : > { %1455 = vmatmul.msk.f32.gmra.mxu2 %vm278_vm0, %v267_v23 }
  0x9a   : > { %v362_v24 = vpop.f32.mrf.mxu1 }
  0x9d   : > { %v350_v25 = vpop.f32.mrf.mxu0 }
  0xa1   : > { %v377_v26 = vpop.f32.mrf.mxu2  ;;  %v392_v27 = vpop.f32.mrf.mxu3 }
  0xa2   : > { %v365_v28 = vpop.f32.mrf.mxu1 }
  0xa3   : > { %v1610_v29 = vpack.c.bf16 %v365_v28, %v362_v24 }
  0xa5   : > { %1643 = vst [vmem:[#allocation2 + $0x18] sm:$0xff] %v1610_v29   ;;  %v353_v31 = vpop.f32.mrf.mxu0 }
  0xa6   : > { %v1600_v32 = vpack.c.bf16 %v353_v31, %v350_v25 }
  0xa8   : > { %1601 = vst [vmem:[#allocation2 + $0x30] sm:$0xff] %v1600_v32  }
  0xa9   : > { %v380_v33 = vpop.f32.mrf.mxu2  ;;  %v395_v34 = vpop.f32.mrf.mxu3 }
  0xaa   : > { %v1635_v35 = vpack.c.bf16 %v395_v34, %v392_v27  ;;  %v368_v36 = vpop.f32.mrf.mxu1 }
  0xac   : > { %1648 = vst [vmem:[#allocation2 + $0x38] sm:$0xff] %v1635_v35  }
  0xad   : > { %v356_v37 = vpop.f32.mrf.mxu0 }
  0xb1   : > { %v383_v38 = vpop.f32.mrf.mxu2  ;;  %v398_v39 = vpop.f32.mrf.mxu3 }
  0xb2   : > { %v1625_v40 = vpack.c.bf16 %v383_v38, %v380_v33  ;;  %v371_v41 = vpop.f32.mrf.mxu1 }
  0xb3   : > { %v1615_v42 = vpack.c.bf16 %v371_v41, %v368_v36 }
  0xb4   : > { %1646 = vst [vmem:[#allocation2 + $0x28] sm:$0xff] %v1625_v40  }
  0xb5   : > { %1644 = vst [vmem:[#allocation2 + $0x10] sm:$0xff] %v1615_v42   ;;  %v359_v43 = vpop.f32.mrf.mxu0 }
  0xb6   : > { %v1605_v44 = vpack.c.bf16 %v359_v43, %v356_v37 }
  0xb8   : > { %1642 = vst [vmem:[#allocation2] sm:$0xff] %v1605_v44  }
  0xb9   : > { %v386_v45 = vpop.f32.mrf.mxu2  ;;  %v401_v46 = vpop.f32.mrf.mxu3 }
  0xba   : > { %v1640_v47 = vpack.c.bf16 %v401_v46, %v398_v39  ;;  %v374_v48 = vpop.f32.mrf.mxu1 }
  0xbb   : > { %v1620_v49 = vpack.c.bf16 %v377_v26, %v374_v48 }
  0xbc   : > { %1649 = vst [vmem:[#allocation2 + $0x8] sm:$0xff] %v1640_v47  }
  0xbd   : > { %1645 = vst [vmem:[#allocation2 + $0x20] sm:$0xff] %v1620_v49  }
  0xc1   : > { %v389_v50 = vpop.f32.mrf.mxu2 }
  0xc2   : > { %v1630_v51 = vpack.c.bf16 %v389_v50, %v386_v45 }
  0xc4   : > { %1647 = vst [vmem:[#allocation2 + $0x40] sm:$0xff] %v1630_v51  }
  0xc5 PF: > { %v475_v52 = vld [vmem:[%s1857_s28] sm:$0xff]  ;;  %v1797_v54 = vmov 1   ;;  %v1798_v55 = vmov 0   ;;  %v460_v56 = vld [vmem:[%s1862_s6 + $0x8] sm:$0xff]  ;;  %v477_v58 = vld [vmem:[%s1857_s28 + $0x10] sm:$0xff]  ;;  %v1799_v59 = vmov 2   ;;  %v456_v26 = vlaneseq }
  0xc6   : > { %v459_v53 = vld [vmem:[%s1862_s6] sm:$0xff]  ;;  %1709 = vset.pattern.permute.xlu2 %v1797_v54  ;;  %1708 = vset.pattern.permute.xlu1 %v1798_v55  ;;  %v476_v57 = vld [vmem:[%s1857_s28 + $0x8] sm:$0xff]  ;;  %v461_v61 = vld [vmem:[%s1862_s6 + $0x10] sm:$0xff]  ;;  %v1800_v43 = vmov 0.0   ;;  %v1801_v48 = vmov 1.0|1.0  }
  0xc7   : > { %1707 = vset.pattern.permute.xlu0 %v1798_v55  ;;  %684 = vperm.xlu2 %1709, %v459_v53   ;;  %v463_v60 = vld [vmem:[%s1862_s6 + $0x20] sm:$0xff]  ;;  %v478_v62 = vld [vmem:[%s1857_s28 + $0x18] sm:$0xff]  ;;  %v480_v2 = vld [vmem:[%s1857_s28 + $0x28] sm:$0xff]  ;;  %v2023_v27 = vand.u32 127, %v456_v26  ;;  %s1802_s21 = smov [#allocation3]   ;;  %s1369_s22 = sshll.u32 %s2377_s5, 4  ;;  %s1370_s22 = int_to_ptr.hbm [resolvable:$true] %s1369_s22 }
  0xc8   : > { %492 = vperm.xlu0 %1707, %v475_v52   ;;  %572 = vperm.xlu1 %1708, %v459_v53   ;;  %v1971_v63 = vld [vmem:[%s1862_s6 + $0x40] sm:$0xff]  ;;  %v462_v0 = vld [vmem:[%s1862_s6 + $0x18] sm:$0xff]  ;;  %v464_v3 = vld [vmem:[%s1862_s6 + $0x28] sm:$0xff]  ;;  %p1688_p6 = scmp.eq.s32.totalorder %s1841_s19, 1  ;;  %s1803_s23 = smov 128  }
  0xc9   : > { %v479_v1 = vld [vmem:[%s1857_s28 + $0x20] sm:$0xff]  ;;  %v466_v4 = vld [vmem:[%s1862_s6 + $0x38] sm:$0xff]  ;;  %v481_v5 = vld [vmem:[%s1857_s28 + $0x30] sm:$0xff]  ;;  %v2032_v31 = vadd.s32 128, %v2023_v27  ;;  %s1804_s25 = smov 8  }
  0xca   : > { %v1595_v6 = vld [vmem:[#allocation2 + $0x38] sm:$0xff]  ;;  %v483_v7 = vld [vmem:[%s1857_s28 + $0x40] sm:$0xff]  ;;  %v465_v8 = vld [vmem:[%s1862_s6 + $0x30] sm:$0xff] }
  0xcb   : > { %1084 = vmatpush.bf16.msra.mxu0 %v1595_v6  ;;  %1668 = vmatpush.bf16.msra.mxu3 %v1595_v6  ;;  %v1594_v9 = vld [vmem:[#allocation2 + $0x40] sm:$0xff]  ;;  %v1593_v10 = vld [vmem:[#allocation2 + $0x28] sm:$0xff]  ;;  %v482_v11 = vld [vmem:[%s1857_s28 + $0x38] sm:$0xff] }
  0xcc   : > { %v1995_v12 = vld [vmem:[%s1862_s6 + $0x48] sm:$0xff]  ;;  %v1592_v13 = vld [vmem:[#allocation2 + $0x20] sm:$0xff]  ;;  %v1591_v14 = vld [vmem:[#allocation2 + $0x10] sm:$0xff] }
  0xcd   : > { %v2001_v15 = vld [vmem:[%s1862_s6 + $0x58] sm:$0xff]  ;;  %v1589_v18 = vld [vmem:[#allocation2] sm:$0xff]  ;;  %v1588_v21 = vld [vmem:[#allocation2 + $0x30] sm:$0xff] }
  0xce   : > { %v1590_v17 = vld [vmem:[#allocation2 + $0x18] sm:$0xff]  ;;  %v487_v19 = vld [vmem:[%s1857_s28 + $0x60] sm:$0xff]  ;;  %v2013_v22 = vld [vmem:[%s1862_s6 + $0x68] sm:$0xff] }
  0xcf   : > { %687 = vperm.xlu2 %1709, %v460_v56   ;;  %1085 = vmatpush.bf16.msra.mxu0 %v1594_v9  ;;  %v1596_v23 = vld [vmem:[#allocation2 + $0x8] sm:$0xff]  ;;  %v485_v32 = vld [vmem:[%s1857_s28 + $0x50] sm:$0xff]  ;;  %v2059_v38 = vld [vmem:[%s1862_s6 + $0x60] sm:$0xff] }
  0xd0   : > { %495 = vperm.xlu0 %1707, %v476_v57   ;;  %575 = vperm.xlu1 %1708, %v460_v56   ;;  %v484_v24 = vld [vmem:[%s1857_s28 + $0x48] sm:$0xff]  ;;  %v469_v37 = vld [vmem:[%s1862_s6 + $0x50] sm:$0xff]  ;;  %v486_v42 = vld [vmem:[%s1857_s28 + $0x58] sm:$0xff] }
  0xd1   : > { %1669 = vmatpush.bf16.msra.mxu3 %v1594_v9  ;;  %1140 = vmatpush.bf16.msra.mxu1 %v1596_v23 }
  0xd3   : > { %1086 = vmatpush.bf16.msra.mxu0 %v1593_v10 }
  0xd5   : > { %1670 = vmatpush.bf16.msra.mxu3 %v1593_v10 }
  0xd7   : > { %1712 = vset.pattern.permute.xlu2 %v1798_v55  ;;  %1087 = vmatpush.bf16.msra.mxu0 %v1592_v13 }
  0xd8   : > { %1710 = vset.pattern.permute.xlu0 %v1799_v59  ;;  %1711 = vset.pattern.permute.xlu1 %v1799_v59 }
  0xd9   : > { %796 = vperm.xlu0 %1710, %v459_v53   ;;  %498 = vperm.xlu2 %1712, %v477_v58  }
  0xda   : > { %799 = vperm.xlu1 %1711, %v460_v56   ;;  %1671 = vmatpush.bf16.msra.mxu3 %v1592_v13 }
  0xdb   : > { %1088 = vmatpush.bf16.msra.mxu0 %v1591_v14 }
  0xde   : > { %1672 = vmatpush.bf16.msra.mxu3 %v1591_v14 }
  0xdf   : > { %1089 = vmatpush.bf16.msra.mxu0 %v1590_v17 }
  0xe1   : > { %808 = vperm.xlu0 %1710, %v463_v60   ;;  %578 = vperm.xlu2 %1712, %v461_v61  }
  0xe2   : > { %1713 = vset.pattern.permute.xlu1 %v1798_v55  ;;  %1673 = vmatpush.bf16.msra.mxu3 %v1590_v17 }
  0xe3   : > { %501 = vperm.xlu1 %1713, %v478_v62   ;;  %1090 = vmatpush.bf16.msra.mxu0 %v1589_v18 }
  0xe6   : > { %1674 = vmatpush.bf16.msra.mxu3 %v1589_v18 }
  0xe7   : > { %1091 = vmatpush.bf16.msra.mxu0 %v1588_v21 }
  0xe9   : > { %820 = vperm.xlu0 %1710, %v1971_v63   ;;  %1715 = vset.pattern.permute.xlu2 %v1797_v54 }
  0xea   : > { %693 = vperm.xlu2 %1715, %v462_v0   ;;  %1675 = vmatpush.bf16.msra.mxu3 %v1588_v21 }
  0xeb   : > { %1714 = vset.pattern.permute.xlu1 %v1797_v54 }
  0xec   : > { %690 = vperm.xlu1 %1714, %v461_v61  }
  0xf1   : > { %1733 = vset.pattern.permute.xlu0 %v1798_v55 }
  0xf2   : > { %581 = vperm.xlu0 %1733, %v462_v0   ;;  %1717 = vset.pattern.permute.xlu2 %v1799_v59 }
  0xf3   : > { %805 = vperm.xlu2 %1717, %v462_v0   ;;  %v488_v0 = vld [vmem:[%s1857_s28 + $0x68] sm:$0xff] }
  0xf4   : > { %1716 = vset.pattern.permute.xlu1 %v1799_v59 }
  0xf5   : > { %802 = vperm.xlu1 %1716, %v461_v61   ;;  %v2122_v61 = vld [vmem:[%s1862_s6 + $0x78] sm:$0xff] }
  0xfa   : > { %504 = vperm.xlu0 %1733, %v479_v1  }
  0xfb   : > { %1719 = vset.pattern.permute.xlu2 %v1798_v55 }
  0xfc   : > { %584 = vperm.xlu2 %1719, %v463_v60  }
  0xfd   : > { %1718 = vset.pattern.permute.xlu1 %v1798_v55 }
  0xfe   : > { %507 = vperm.xlu1 %1718, %v480_v2  }
 0x102   : > { %587 = vperm.xlu0 %1733, %v464_v3  }
 0x104   : > { %1721 = vset.pattern.permute.xlu2 %v1797_v54 }
 0x105   : > { %699 = vperm.xlu2 %1721, %v464_v3  }
 0x106   : > { %1720 = vset.pattern.permute.xlu1 %v1797_v54 }
 0x107   : > { %696 = vperm.xlu1 %1720, %v463_v60  }
 0x10a   : > { %593 = vperm.xlu0 %1733, %v466_v4  }
 0x10d   : > { %1723 = vset.pattern.permute.xlu2 %v1798_v55 }
 0x10e   : > { %510 = vperm.xlu2 %1723, %v481_v5  }
 0x10f   : > { %1722 = vset.pattern.permute.xlu1 %v1799_v59 }
 0x110   : > { %811 = vperm.xlu1 %1722, %v464_v3  }
 0x112   : > { %516 = vperm.xlu0 %1733, %v483_v7  }
 0x116   : > { %590 = vperm.xlu2 %1723, %v465_v8  }
 0x118   : > { %1724 = vset.pattern.permute.xlu1 %v1798_v55 }
 0x119   : > { %513 = vperm.xlu1 %1724, %v482_v11  }
 0x11a   : > { %599 = vperm.xlu0 %1733, %v1995_v12  }
 0x11e   : > { %1726 = vset.pattern.permute.xlu2 %v1797_v54 }
 0x11f   : > { %705 = vperm.xlu2 %1726, %v466_v4  }
 0x121   : > { %1725 = vset.pattern.permute.xlu1 %v1797_v54  ;;  %v2004_v16 = vpop.permute.xlu2 %684 }
 0x122   : > { %702 = vperm.xlu1 %1725, %v465_v8   ;;  %605 = vperm.xlu0 %1733, %v2001_v15   ;;  %vm732_vm5 = vcmp.eq.s32.totalorder %v2004_v16, %v2032_v31  ;;  %vm731_vm12 = vcmp.eq.s32.totalorder %v2004_v16, %v2023_v27 }
 0x127   : > { %1728 = vset.pattern.permute.xlu2 %v1799_v59 }
 0x128   : > { %817 = vperm.xlu2 %1728, %v466_v4  }
 0x129   : > { %v2009_v20 = vpop.permute.xlu2 %687 }
 0x12a   : > { %1727 = vset.pattern.permute.xlu1 %v1799_v59  ;;  %528 = vperm.xlu0 %1733, %v487_v19   ;;  %vm734_vm0 = vcmp.eq.s32.totalorder %v2009_v20, %v2032_v31 }
 0x12b   : > { %814 = vperm.xlu1 %1727, %v465_v8   ;;  %v489_v8 = vld [vmem:[%s1857_s28 + $0x70] sm:$0xff] }
 0x130   : > { %1730 = vset.pattern.permute.xlu2 %v1798_v55 }
 0x131   : > { %596 = vperm.xlu2 %1730, %v1971_v63  }
 0x132   : > { %611 = vperm.xlu0 %1733, %v2013_v22  }
 0x133   : > { %1729 = vset.pattern.permute.xlu1 %v1798_v55  ;;  %v2020_v25 = vpop.permute.xlu2 %498 }
 0x134   : > { %519 = vperm.xlu1 %1729, %v484_v24  }
 0x139   : > { %1732 = vset.pattern.permute.xlu2 %v1797_v54 }
 0x13a   : > { %v493_v28 = vpop.permute.xlu0 %492  ;;  %711 = vperm.xlu2 %1732, %v1995_v12   ;;  %v573_v29 = vpop.permute.xlu1 %572  ;;  %1745 = vset.pattern.permute.xlu0 %v1799_v59 }
 0x13b   : > { %v2028_v30 = vpop.permute.xlu2 %578  ;;  %vm540_vm1 = vcmp.eq.s32.totalorder %v493_v28, %v2032_v31  ;;  %vm620_vm2 = vcmp.eq.s32.totalorder %v573_v29, %v2032_v31  ;;  %vm539_vm3 = vcmp.eq.s32.totalorder %v493_v28, %v2023_v27  ;;  %vm619_vm4 = vcmp.eq.s32.totalorder %v573_v29, %v2023_v27  ;;  %832 = vperm.xlu0 %1745, %v2059_v38  }
 0x13c   : > { %1731 = vset.pattern.permute.xlu1 %v1797_v54  ;;  %vm652_vm6 = vmor %vm540_vm1, %vm620_vm2  ;;  %vm733_vm2 = vcmp.eq.s32.totalorder %v2009_v20, %v2023_v27 }
 0x13d   : > { %708 = vperm.xlu1 %1731, %v1971_v63   ;;  %vm651_vm9 = vmor %vm539_vm3, %vm619_vm4 }
 0x13e   : > { %vm2053_vm13 = vmor %vm652_vm6, %vm732_vm5 }
 0x13f   : > { %vm2063_vm1 = vmor %vm651_vm9, %vm731_vm12  ;;  %vm2378_vm12 = vcmask 130048  }
 0x142   : > { %v496_v33 = vpop.permute.xlu0 %495  ;;  %1735 = vset.pattern.permute.xlu2 %v1798_v55  ;;  %v576_v34 = vpop.permute.xlu1 %575 }
 0x143   : > { %522 = vperm.xlu2 %1735, %v485_v32   ;;  %vm542_vm7 = vcmp.eq.s32.totalorder %v496_v33, %v2032_v31  ;;  %vm622_vm8 = vcmp.eq.s32.totalorder %v576_v34, %v2032_v31  ;;  %vm541_vm10 = vcmp.eq.s32.totalorder %v496_v33, %v2023_v27  ;;  %vm621_vm11 = vcmp.eq.s32.totalorder %v576_v34, %v2023_v27 }
 0x144   : > { %v2046_v35 = vpop.permute.xlu2 %693  ;;  %vm654_vm14 = vmor %vm542_vm7, %vm622_vm8  ;;  %1749 = vset.pattern.permute.xlu0 %v1798_v55 }
 0x145   : > { %1734 = vset.pattern.permute.xlu1 %v1799_v59  ;;  %vm653_vm15 = vmor %vm541_vm10, %vm621_vm11  ;;  %617 = vperm.xlu0 %1749, %v2122_v61  }
 0x146   : > { %823 = vperm.xlu1 %1734, %v1995_v12   ;;  %vm766_vm3 = vmor %vm654_vm14, %vm734_vm0  ;;  %vm623_vm0 = vcmp.eq.s32.totalorder %v2028_v30, %v2023_v27  ;;  %v473_v12 = vld [vmem:[%s1862_s6 + $0x70] sm:$0xff] }
 0x147   : > { %vm765_vm6 = vmor %vm653_vm15, %vm733_vm2  ;;  %vm543_vm15 = vcmp.eq.s32.totalorder %v2020_v25, %v2023_v27  ;;  %vm624_vm2 = vcmp.eq.s32.totalorder %v2028_v30, %v2032_v31 }
 0x14b   : > { %v797_v40 = vpop.permute.xlu0 %796  ;;  %602 = vperm.xlu2 %1735, %v469_v37  }
 0x14c   : > { %vm843_vm4 = vcmp.eq.s32.totalorder %v797_v40, %v2023_v27  ;;  %vm844_vm5 = vcmp.eq.s32.totalorder %v797_v40, %v2032_v31  ;;  %v800_v41 = vpop.permute.xlu1 %799 }
 0x14d   : > { %vm876_vm7 = vmor %vm2053_vm13, %vm844_vm5  ;;  %vm845_vm8 = vcmp.eq.s32.totalorder %v800_v41, %v2023_v27  ;;  %vm846_vm9 = vcmp.eq.s32.totalorder %v800_v41, %v2032_v31  ;;  %v806_v46 = vpop.permute.xlu2 %805  ;;  %1754 = vset.pattern.permute.xlu0 %v1799_v59 }
 0x14e   : > { %v1461_v44 = vsel %vm876_vm7, 1.0, %v1800_v43  ;;  %vm878_vm10 = vmor %vm766_vm3, %vm846_vm9  ;;  %1736 = vset.pattern.permute.xlu1 %v1798_v55 }
 0x14f   : > { %v1463_v45 = vsel %vm878_vm10, 1.0, %v1800_v43  ;;  %525 = vperm.xlu1 %1736, %v486_v42   ;;  %vm875_vm11 = vmor %vm2063_vm1, %vm843_vm4  ;;  %vm544_vm1 = vcmp.eq.s32.totalorder %v2020_v25, %v2032_v31 }
 0x150   : > { %vm877_vm14 = vmor %vm765_vm6, %vm845_vm8  ;;  %v972_v47 = vpack.c.bf16 %v1463_v45, %v1461_v44 }
 0x151   : > { %vm1528_vm13 = vmpackc.low %vm877_vm14, %vm875_vm11 }
 0x152   : > { %1529 = vmatmul.msk.bf16.vlgmr.msra.gmra.mxu0 %vm1528_vm13, %v1801_v48  ;;  %1544 = vmatmul.msk.bf16.vlgmr.msra.gmra.mxu1 %vm2378_vm12, %v972_v47  ;;  %vm655_vm4 = vmor %vm543_vm15, %vm623_vm0  ;;  %vm850_vm13 = vcmp.eq.s32.totalorder %v806_v46, %v2032_v31  ;;  %vm738_vm0 = vcmp.eq.s32.totalorder %v2046_v35, %v2032_v31 }
 0x153   : > { %1738 = vset.pattern.permute.xlu2 %v1797_v54  ;;  %v2085_v49 = vpop.permute.xlu0 %808  ;;  %vm656_vm6 = vmor %vm544_vm1, %vm624_vm2 }
 0x154   : > { %717 = vperm.xlu2 %1738, %v2001_v15  }
 0x155   : > { %v502_v50 = vpop.permute.xlu1 %501 }
 0x156   : > { %v2090_v51 = vpop.permute.xlu2 %584  ;;  %vm545_vm8 = vcmp.eq.s32.totalorder %v502_v50, %v2023_v27  ;;  %vm546_vm14 = vcmp.eq.s32.totalorder %v502_v50, %v2032_v31 }
 0x157   : > { %1737 = vset.pattern.permute.xlu1 %v1797_v54 }
 0x158   : > { %714 = vperm.xlu1 %1737, %v469_v37  }
 0x15b   : > { %v2092_v52 = vpop.permute.xlu0 %820 }
 0x15c   : > { %1740 = vset.pattern.permute.xlu2 %v1799_v59 }
 0x15d   : > { %829 = vperm.xlu2 %1740, %v2001_v15   ;;  %v490_v15 = vld [vmem:[%s1857_s28 + $0x78] sm:$0xff] }
 0x15e   : > { %v691_v53 = vpop.permute.xlu1 %690 }
 0x15f   : > { %vm735_vm3 = vcmp.eq.s32.totalorder %v691_v53, %v2023_v27  ;;  %vm736_vm5 = vcmp.eq.s32.totalorder %v691_v53, %v2032_v31  ;;  %v2107_v56 = vpop.permute.xlu2 %699 }
 0x160   : > { %1739 = vset.pattern.permute.xlu1 %v1799_v59  ;;  %vm2109_vm7 = vmor %vm655_vm4, %vm735_vm3 }
 0x161   : > { %826 = vperm.xlu1 %1739, %v469_v37   ;;  %vm2114_vm9 = vmor %vm656_vm6, %vm736_vm5  ;;  %vm737_vm6 = vcmp.eq.s32.totalorder %v2046_v35, %v2023_v27 }
 0x164   : > { %v582_v58 = vpop.permute.xlu0 %581 }
 0x165   : > { %vm625_vm10 = vcmp.eq.s32.totalorder %v582_v58, %v2023_v27  ;;  %vm626_vm11 = vcmp.eq.s32.totalorder %v582_v58, %v2032_v31  ;;  %1742 = vset.pattern.permute.xlu2 %v1798_v55 }
 0x166   : > { %vm2126_vm15 = vmor %vm545_vm8, %vm625_vm10  ;;  %608 = vperm.xlu2 %1742, %v2059_v38   ;;  %vm849_vm8 = vcmp.eq.s32.totalorder %v806_v46, %v2023_v27 }
 0x167   : > { %vm658_vm1 = vmor %vm546_vm14, %vm626_vm11  ;;  %v803_v63 = vpop.permute.xlu1 %802 }
 0x168   : > { %vm770_vm2 = vmor %vm658_vm1, %vm738_vm0  ;;  %vm848_vm3 = vcmp.eq.s32.totalorder %v803_v63, %v2032_v31  ;;  %vm847_vm5 = vcmp.eq.s32.totalorder %v803_v63, %v2023_v27  ;;  %v2149_v5 = vpop.permute.xlu2 %510  ;;  %vm628_vm1 = vcmp.eq.s32.totalorder %v2090_v51, %v2032_v31 }
 0x169   : > { %vm882_vm4 = vmor %vm770_vm2, %vm850_vm13  ;;  %1741 = vset.pattern.permute.xlu1 %v1798_v55 }
 0x16a   : > { %vm880_vm10 = vmor %vm2114_vm9, %vm848_vm3  ;;  %531 = vperm.xlu1 %1741, %v488_v0   ;;  %v1467_v1 = vsel %vm882_vm4, 1.0, %v1800_v43 }
 0x16b   : > { %v1465_v2 = vsel %vm880_vm10, 1.0, %v1800_v43  ;;  %vm769_vm11 = vmor %vm2126_vm15, %vm737_vm6  ;;  %vm742_vm6 = vcmp.eq.s32.totalorder %v2107_v56, %v2032_v31 }
 0x16c   : > { %vm879_vm14 = vmor %vm2109_vm7, %vm847_vm5  ;;  %v505_v3 = vpop.permute.xlu0 %504  ;;  %v974_v4 = vpack.c.bf16 %v1467_v1, %v1465_v2  ;;  %vm627_vm7 = vcmp.eq.s32.totalorder %v2090_v51, %v2023_v27 }
 0x16d   : > { %vm881_vm13 = vmor %vm769_vm11, %vm849_vm8  ;;  %vm547_vm9 = vcmp.eq.s32.totalorder %v505_v3, %v2023_v27  ;;  %vm548_vm2 = vcmp.eq.s32.totalorder %v505_v3, %v2032_v31 }
 0x16e   : > { %vm1530_vm0 = vmpackc.low %vm881_vm13, %vm879_vm14  ;;  %1545 = vmatmul.msk.bf16.gmra.mxu1 %vm2378_vm12, %v974_v4  ;;  %1744 = vset.pattern.permute.xlu2 %v1797_v54  ;;  %v2397_v4 = vmov 0 }
 0x16f   : > { %1531 = vmatmul.msk.bf16.gmra.mxu0 %vm1530_vm0, %v1801_v48  ;;  %723 = vperm.xlu2 %1744, %v2013_v22   ;;  %vm2169_vm3 = vmor %vm547_vm9, %vm627_vm7  ;;  %vm741_vm7 = vcmp.eq.s32.totalorder %v2107_v56, %v2023_v27 }
 0x170   : > { %v508_v6 = vpop.permute.xlu1 %507  ;;  %v2162_v9 = vpop.permute.xlu2 %590  ;;  %vm660_vm10 = vmor %vm548_vm2, %vm628_vm1  ;;  %vm851_vm1 = vcmp.eq.s32.totalorder %v2085_v49, %v2023_v27 }
 0x171   : > { %vm550_vm4 = vcmp.eq.s32.totalorder %v508_v6, %v2032_v31  ;;  %vm549_vm11 = vcmp.eq.s32.totalorder %v508_v6, %v2023_v27 }
 0x172   : > { %1743 = vset.pattern.permute.xlu1 %v1797_v54 }
 0x173   : > { %720 = vperm.xlu1 %1743, %v2059_v38  }
 0x174   : > { %v588_v7 = vpop.permute.xlu0 %587 }
 0x175   : > { %vm630_vm15 = vcmp.eq.s32.totalorder %v588_v7, %v2032_v31  ;;  %vm629_vm5 = vcmp.eq.s32.totalorder %v588_v7, %v2023_v27 }
 0x176   : > { %vm662_vm8 = vmor %vm550_vm4, %vm630_vm15  ;;  %vm852_vm15 = vcmp.eq.s32.totalorder %v2085_v49, %v2032_v31 }
 0x177   : > { %1747 = vset.pattern.permute.xlu2 %v1798_v55  ;;  %vm661_vm13 = vmor %vm549_vm11, %vm629_vm5 }
 0x178   : > { %534 = vperm.xlu2 %1747, %v489_v8   ;;  %vm774_vm9 = vmor %vm662_vm8, %vm742_vm6 }
 0x179   : > { %v697_v10 = vpop.permute.xlu1 %696  ;;  %v706_v13 = vpop.permute.xlu2 %705  ;;  %vm773_vm5 = vmor %vm661_vm13, %vm741_vm7  ;;  %vm2391_vm13 = vcmask 130048  }
 0x17a   : > { %vm740_vm14 = vcmp.eq.s32.totalorder %v697_v10, %v2032_v31  ;;  %vm739_vm0 = vcmp.eq.s32.totalorder %v697_v10, %v2023_v27 }
 0x17b   : > { %1746 = vset.pattern.permute.xlu1 %v1799_v59  ;;  %vm772_vm4 = vmor %vm660_vm10, %vm740_vm14 }
 0x17c   : > { %835 = vperm.xlu1 %1746, %v2013_v22   ;;  %vm771_vm2 = vmor %vm2169_vm3, %vm739_vm0 }
 0x17d   : > { %vm884_vm11 = vmor %vm772_vm4, %vm852_vm15  ;;  %vm551_vm15 = vcmp.eq.s32.totalorder %v2149_v5, %v2023_v27  ;;  %vm631_vm4 = vcmp.eq.s32.totalorder %v2162_v9, %v2023_v27 }
 0x17e   : > { %vm883_vm8 = vmor %vm771_vm2, %vm851_vm1  ;;  %v1469_v16 = vsel %vm884_vm11, 1.0, %v1800_v43  ;;  %vm746_vm1 = vcmp.eq.s32.totalorder %v706_v13, %v2032_v31 }
 0x180   : > { %614 = vperm.xlu2 %1747, %v473_v12  }
 0x182   : > { %v812_v14 = vpop.permute.xlu1 %811  ;;  %v818_v19 = vpop.permute.xlu2 %817 }
 0x183   : > { %vm853_vm12 = vcmp.eq.s32.totalorder %v812_v14, %v2023_v27  ;;  %vm854_vm6 = vcmp.eq.s32.totalorder %v812_v14, %v2032_v31 }
 0x184   : > { %vm886_vm10 = vmor %vm774_vm9, %vm854_vm6  ;;  %1748 = vset.pattern.permute.xlu1 %v1798_v55  ;;  %v594_v55 = vpop.permute.xlu0 %593  ;;  %vm552_vm6 = vcmp.eq.s32.totalorder %v2149_v5, %v2032_v31 }
 0x185   : > { %v1471_v17 = vsel %vm886_vm10, 1.0, %v1800_v43  ;;  %537 = vperm.xlu1 %1748, %v490_v15   ;;  %vm885_vm3 = vmor %vm773_vm5, %vm853_vm12  ;;  %vm634_vm12 = vcmp.eq.s32.totalorder %v594_v55, %v2032_v31  ;;  %vm633_vm7 = vcmp.eq.s32.totalorder %v594_v55, %v2023_v27  ;;  %vm745_vm5 = vcmp.eq.s32.totalorder %v706_v13, %v2023_v27 }
 0x186   : > { %vm1532_vm14 = vmpackc.low %vm885_vm3, %vm883_vm8  ;;  %v976_v18 = vpack.c.bf16 %v1471_v17, %v1469_v16  ;;  %vm632_vm8 = vcmp.eq.s32.totalorder %v2162_v9, %v2032_v31  ;;  %vm858_vm3 = vcmp.eq.s32.totalorder %v818_v19, %v2032_v31 }
 0x187   : > { %1533 = vmatmul.msk.bf16.gmra.mxu0 %vm1532_vm14, %v1801_v48  ;;  %vm663_vm10 = vmor %vm551_vm15, %vm631_vm4 }
 0x188   : > { %1546 = vmatmul.msk.bf16.gmra.mxu1 %vm2391_vm13, %v976_v18  ;;  %1751 = vset.pattern.permute.xlu2 %v1797_v54  ;;  %vm857_vm13 = vcmp.eq.s32.totalorder %v818_v19, %v2023_v27 }
 0x189   : > { %729 = vperm.xlu2 %1751, %v2122_v61  }
 0x18b   : > { %v514_v20 = vpop.permute.xlu1 %513  ;;  %v597_v21 = vpop.permute.xlu2 %596 }
 0x18c   : > { %vm554_vm0 = vcmp.eq.s32.totalorder %v514_v20, %v2032_v31  ;;  %vm553_vm9 = vcmp.eq.s32.totalorder %v514_v20, %v2023_v27  ;;  %v517_v28 = vpop.permute.xlu0 %516 }
 0x18d   : > { %1750 = vset.pattern.permute.xlu1 %v1797_v54  ;;  %vm666_vm2 = vmor %vm554_vm0, %vm634_vm12 }
 0x18e   : > { %726 = vperm.xlu1 %1750, %v473_v12   ;;  %vm665_vm11 = vmor %vm553_vm9, %vm633_vm7 }
 0x18f   : > { %vm778_vm14 = vmor %vm666_vm2, %vm746_vm1 }
 0x190   : > { %vm777_vm12 = vmor %vm665_vm11, %vm745_vm5 }
 0x191   : > { %1753 = vset.pattern.permute.xlu2 %v1799_v59  ;;  %vm664_vm0 = vmor %vm552_vm6, %vm632_vm8 }
 0x192   : > { %841 = vperm.xlu2 %1753, %v2122_v61   ;;  %vm890_vm9 = vmor %vm778_vm14, %vm858_vm3  ;;  %vm2392_vm14 = vcmask 130048  }
 0x193   : > { %vm889_vm15 = vmor %vm777_vm12, %vm857_vm13  ;;  %v1475_v24 = vsel %vm890_vm9, 1.0, %v1800_v43  ;;  %vm635_vm13 = vcmp.eq.s32.totalorder %v597_v21, %v2023_v27  ;;  %vm636_vm9 = vcmp.eq.s32.totalorder %v597_v21, %v2032_v31 }
 0x194   : > { %v703_v54 = vpop.permute.xlu1 %702  ;;  %v712_v22 = vpop.permute.xlu2 %711 }
 0x195   : > { %vm743_vm7 = vcmp.eq.s32.totalorder %v703_v54, %v2023_v27  ;;  %vm744_vm4 = vcmp.eq.s32.totalorder %v703_v54, %v2032_v31  ;;  %v600_v32 = vpop.permute.xlu0 %599 }
 0x196   : > { %1752 = vset.pattern.permute.xlu1 %v1799_v59  ;;  %vm775_vm1 = vmor %vm663_vm10, %vm743_vm7  ;;  %vm555_vm10 = vcmp.eq.s32.totalorder %v517_v28, %v2023_v27  ;;  %vm638_vm12 = vcmp.eq.s32.totalorder %v600_v32, %v2032_v31  ;;  %vm556_vm7 = vcmp.eq.s32.totalorder %v517_v28, %v2032_v31 }
 0x197   : > { %838 = vperm.xlu1 %1752, %v473_v12   ;;  %vm776_vm2 = vmor %vm664_vm0, %vm744_vm4 }
 0x198   : > { %vm667_vm4 = vmor %vm555_vm10, %vm635_vm13 }
 0x19d   : > { %v815_v59 = vpop.permute.xlu1 %814  ;;  %v2229_v30 = vpop.permute.xlu2 %522 }
 0x19e   : > { %vm855_vm5 = vcmp.eq.s32.totalorder %v815_v59, %v2023_v27  ;;  %vm856_vm11 = vcmp.eq.s32.totalorder %v815_v59, %v2032_v31  ;;  %v606_v42 = vpop.permute.xlu0 %605 }
 0x19f   : > { %vm888_vm6 = vmor %vm776_vm2, %vm856_vm11  ;;  %vm750_vm2 = vcmp.eq.s32.totalorder %v712_v22, %v2032_v31 }
 0x1a0   : > { %v1473_v23 = vsel %vm888_vm6, 1.0, %v1800_v43  ;;  %vm887_vm8 = vmor %vm775_vm1, %vm855_vm5 }
 0x1a1   : > { %vm1534_vm3 = vmpackc.low %vm889_vm15, %vm887_vm8  ;;  %v978_v25 = vpack.c.bf16 %v1475_v24, %v1473_v23  ;;  %vm637_vm15 = vcmp.eq.s32.totalorder %v600_v32, %v2023_v27 }
 0x1a2   : > { %1535 = vmatmul.msk.bf16.gmra.mxu0 %vm1534_vm3, %v1801_v48  ;;  %vm668_vm11 = vmor %vm556_vm7, %vm636_vm9  ;;  %vm859_vm9 = vcmp.eq.s32.totalorder %v2092_v52, %v2023_v27 }
 0x1a3   : > { %1547 = vmatmul.msk.bf16.gmra.mxu1 %vm2392_vm14, %v978_v25  ;;  %vm749_vm14 = vcmp.eq.s32.totalorder %v712_v22, %v2023_v27 }
 0x1a5   : > { %v603_v34 = vpop.permute.xlu2 %602 }
 0x1a6   : > { %v520_v29 = vpop.permute.xlu1 %519 }
 0x1a7   : > { %vm558_vm0 = vcmp.eq.s32.totalorder %v520_v29, %v2032_v31  ;;  %vm557_vm1 = vcmp.eq.s32.totalorder %v520_v29, %v2023_v27 }
 0x1a8   : > { %vm670_vm5 = vmor %vm558_vm0, %vm638_vm12  ;;  %vm860_vm12 = vcmp.eq.s32.totalorder %v2092_v52, %v2032_v31  ;;  %v529_v52 = vpop.permute.xlu0 %528 }
 0x1a9   : > { %vm669_vm8 = vmor %vm557_vm1, %vm637_vm15 }
 0x1aa   : > { %vm782_vm10 = vmor %vm670_vm5, %vm750_vm2 }
 0x1ab   : > { %vm781_vm7 = vmor %vm669_vm8, %vm749_vm14  ;;  %vm2393_vm8 = vcmask 130048  }
 0x1ae   : > { %v718_v39 = vpop.permute.xlu2 %717 }
 0x1af   : > { %v709_v33 = vpop.permute.xlu1 %708 }
 0x1b0   : > { %vm748_vm6 = vcmp.eq.s32.totalorder %v709_v33, %v2032_v31  ;;  %vm747_vm3 = vcmp.eq.s32.totalorder %v709_v33, %v2023_v27  ;;  %v612_v1 = vpop.permute.xlu0 %611 }
 0x1b1   : > { %vm780_vm13 = vmor %vm668_vm11, %vm748_vm6 }
 0x1b2   : > { %vm779_vm0 = vmor %vm667_vm4, %vm747_vm3 }
 0x1b3   : > { %vm892_vm1 = vmor %vm780_vm13, %vm860_vm12  ;;  %vm559_vm13 = vcmp.eq.s32.totalorder %v2229_v30, %v2023_v27  ;;  %vm641_vm12 = vcmp.eq.s32.totalorder %v606_v42, %v2023_v27 }
 0x1b4   : > { %vm891_vm5 = vmor %vm779_vm0, %vm859_vm9  ;;  %v1477_v36 = vsel %vm892_vm1, 1.0, %v1800_v43  ;;  %vm639_vm0 = vcmp.eq.s32.totalorder %v603_v34, %v2023_v27  ;;  %vm753_vm1 = vcmp.eq.s32.totalorder %v718_v39, %v2023_v27 }
 0x1b7   : > { %v830_v41 = vpop.permute.xlu2 %829 }
 0x1b8   : > { %v824_v35 = vpop.permute.xlu1 %823  ;;  %v833_v5 = vpop.permute.xlu0 %832 }
 0x1b9   : > { %vm861_vm15 = vcmp.eq.s32.totalorder %v824_v35, %v2023_v27  ;;  %vm862_vm2 = vcmp.eq.s32.totalorder %v824_v35, %v2032_v31 }
 0x1ba   : > { %vm894_vm6 = vmor %vm782_vm10, %vm862_vm2  ;;  %vm642_vm10 = vcmp.eq.s32.totalorder %v606_v42, %v2032_v31  ;;  %vm560_vm2 = vcmp.eq.s32.totalorder %v2229_v30, %v2032_v31 }
 0x1bb   : > { %v1479_v37 = vsel %vm894_vm6, 1.0, %v1800_v43  ;;  %vm893_vm4 = vmor %vm781_vm7, %vm861_vm15  ;;  %vm754_vm7 = vcmp.eq.s32.totalorder %v718_v39, %v2032_v31 }
 0x1bc   : > { %vm1536_vm11 = vmpackc.low %vm893_vm4, %vm891_vm5  ;;  %v980_v38 = vpack.c.bf16 %v1479_v37, %v1477_v36  ;;  %vm640_vm5 = vcmp.eq.s32.totalorder %v603_v34, %v2032_v31  ;;  %vm866_vm4 = vcmp.eq.s32.totalorder %v830_v41, %v2032_v31 }
 0x1bd   : > { %1537 = vmatmul.msk.bf16.gmra.mxu0 %vm1536_vm11, %v1801_v48  ;;  %vm671_vm6 = vmor %vm559_vm13, %vm639_vm0 }
 0x1be   : > { %1548 = vmatmul.msk.bf16.gmra.mxu1 %vm2393_vm8, %v980_v38  ;;  %vm865_vm8 = vcmp.eq.s32.totalorder %v830_v41, %v2023_v27 }
 0x1c0   : > { %v609_v49 = vpop.permute.xlu2 %608  ;;  %v618_v55 = vpop.permute.xlu0 %617 }
 0x1c1   : > { %v526_v40 = vpop.permute.xlu1 %525 }
 0x1c2   : > { %vm562_vm3 = vcmp.eq.s32.totalorder %v526_v40, %v2032_v31  ;;  %vm561_vm14 = vcmp.eq.s32.totalorder %v526_v40, %v2023_v27 }
 0x1c3   : > { %vm674_vm9 = vmor %vm562_vm3, %vm642_vm10 }
 0x1c4   : > { %vm673_vm15 = vmor %vm561_vm14, %vm641_vm12 }
 0x1c5   : > { %vm786_vm11 = vmor %vm674_vm9, %vm754_vm7 }
 0x1c6   : > { %vm785_vm3 = vmor %vm673_vm15, %vm753_vm1 }
 0x1c7   : > { %vm672_vm10 = vmor %vm560_vm2, %vm640_vm5 }
 0x1c8   : > { %vm898_vm14 = vmor %vm786_vm11, %vm866_vm4  ;;  %vm643_vm11 = vcmp.eq.s32.totalorder %v609_v49, %v2023_v27 }
 0x1c9   : > { %vm2269_vm13 = vmor %vm785_vm3, %vm865_vm8  ;;  %v1483_v56 = vsel %vm898_vm14, 1.0, %v1800_v43  ;;  %v724_v62 = vpop.permute.xlu2 %723  ;;  %vm563_vm3 = vcmp.eq.s32.totalorder %v529_v52, %v2023_v27 }
 0x1ca   : > { %v715_v44 = vpop.permute.xlu1 %714  ;;  %vm2290_vm14 = vmor %vm563_vm3, %vm643_vm11 }
 0x1cb   : > { %vm751_vm12 = vcmp.eq.s32.totalorder %v715_v44, %v2023_v27  ;;  %vm752_vm0 = vcmp.eq.s32.totalorder %v715_v44, %v2032_v31  ;;  %v2398_v4 = vsel %vm2290_vm14, 4294967295, %v2397_v4  ;;  %vm868_vm14 = vcmp.eq.s32.totalorder %v833_v5, %v2032_v31 }
 0x1cc   : > { %vm783_vm7 = vmor %vm671_vm6, %vm751_vm12  ;;  %vm2396_vm6 = vcmask 130048   ;;  %vm646_vm12 = vcmp.eq.s32.totalorder %v612_v1, %v2032_v31 }
 0x1cd   : > { %vm784_vm9 = vmor %vm672_vm10, %vm752_vm0  ;;  %vm644_vm10 = vcmp.eq.s32.totalorder %v609_v49, %v2032_v31 }
 0x1cf   : > { %v1093_v45 = vpop.f32.mrf.mxu0  ;;  %v1142_v46 = vpop.f32.mrf.mxu1 }
 0x1d0   : > { %v1143_v47 = vadd.f32 %v1142_v46, %v1093_v45 }
 0x1d2   : > { %v2284_v2 = vpop.permute.xlu2 %534 }
 0x1d3   : > { %v827_v51 = vpop.permute.xlu1 %826 }
 0x1d4   : > { %vm863_vm1 = vcmp.eq.s32.totalorder %v827_v51, %v2023_v27  ;;  %vm864_vm15 = vcmp.eq.s32.totalorder %v827_v51, %v2032_v31 }
 0x1d5   : > { %vm896_vm2 = vmor %vm784_vm9, %vm864_vm15 }
 0x1d6   : > { %v1481_v53 = vsel %vm896_vm2, 1.0, %v1800_v43  ;;  %vm895_vm5 = vmor %vm783_vm7, %vm863_vm1  ;;  %vm758_vm7 = vcmp.eq.s32.totalorder %v724_v62, %v2032_v31  ;;  %vm645_vm1 = vcmp.eq.s32.totalorder %v612_v1, %v2023_v27 }
 0x1d7   : > { %v1095_v57 = vpop.f32.mrf.mxu0  ;;  %vm1538_vm4 = vmpackc.low %vm2269_vm13, %vm895_vm5  ;;  %v1144_v58 = vpop.f32.mrf.mxu1  ;;  %v982_v60 = vpack.c.bf16 %v1483_v56, %v1481_v53  ;;  %vm564_vm13 = vcmp.eq.s32.totalorder %v529_v52, %v2032_v31 }
 0x1d8   : > { %1539 = vmatmul.msk.bf16.gmra.mxu0 %vm1538_vm4, %v1801_v48  ;;  %v1145_v61 = vadd.f32 %v1144_v58, %v1095_v57  ;;  %vm676_vm15 = vmor %vm564_vm13, %vm644_vm10  ;;  %vm867_vm10 = vcmp.eq.s32.totalorder %v833_v5, %v2023_v27 }
 0x1d9   : > { %1549 = vmatmul.msk.bf16.gmra.mxu1 %vm2396_vm6, %v982_v60  ;;  %vm757_vm6 = vcmp.eq.s32.totalorder %v724_v62, %v2023_v27 }
 0x1da   : > { %v2281_v63 = vpack.c.bf16 %v1145_v61, %v1143_v47  ;;  %v615_v9 = vpop.permute.xlu2 %614 }
 0x1dc   : > { %v532_v0 = vpop.permute.xlu1 %531 }
 0x1dd   : > { %vm566_vm8 = vcmp.eq.s32.totalorder %v532_v0, %v2032_v31  ;;  %vm565_vm0 = vcmp.eq.s32.totalorder %v532_v0, %v2023_v27 }
 0x1de   : > { %vm678_vm9 = vmor %vm566_vm8, %vm646_vm12  ;;  %vm2401_vm8 = vnez %v2398_v4 }
 0x1df   : > { %vm677_vm5 = vmor %vm565_vm0, %vm645_vm1 }
 0x1e0   : > { %vm2301_vm11 = vmor %vm678_vm9, %vm758_vm7 }
 0x1e1   : > { %vm789_vm0 = vmor %vm677_vm5, %vm757_vm6  ;;  %vm649_vm5 = vcmp.eq.s32.totalorder %v618_v55, %v2023_v27 }
 0x1e3   : > { %v730_v18 = vpop.permute.xlu2 %729 }
 0x1e5   : > { %v721_v3 = vpop.permute.xlu1 %720 }
 0x1e6   : > { %vm756_vm2 = vcmp.eq.s32.totalorder %v721_v3, %v2032_v31  ;;  %vm755_vm4 = vcmp.eq.s32.totalorder %v721_v3, %v2023_v27 }
 0x1e7   : > { %vm788_vm3 = vmor %vm676_vm15, %vm756_vm2 }
 0x1e8   : > { %vm787_vm12 = vmor %vm2401_vm8, %vm755_vm4  ;;  %vm567_vm8 = vcmp.eq.s32.totalorder %v2284_v2, %v2023_v27 }
 0x1e9   : > { %vm900_vm13 = vmor %vm788_vm3, %vm868_vm14  ;;  %vm2402_vm14 = vcmask 130048  }
 0x1ea   : > { %vm899_vm1 = vmor %vm787_vm12, %vm867_vm10  ;;  %v1485_v12 = vsel %vm900_vm13, 1.0, %v1800_v43  ;;  %vm647_vm12 = vcmp.eq.s32.totalorder %v615_v9, %v2023_v27  ;;  %vm761_vm10 = vcmp.eq.s32.totalorder %v730_v18, %v2023_v27  ;;  %vm762_vm13 = vcmp.eq.s32.totalorder %v730_v18, %v2032_v31 }
 0x1eb   : > { %v1147_v7 = vpop.f32.mrf.mxu1 }
 0x1ec   : > { %v1098_v8 = vpop.f32.mrf.mxu0  ;;  %v842_v21 = vpop.permute.xlu2 %841 }
 0x1ed   : > { %v1148_v10 = vadd.f32 %v1147_v7, %v1098_v8 }
 0x1ee   : > { %v836_v11 = vpop.permute.xlu1 %835 }
 0x1ef   : > { %vm869_vm7 = vcmp.eq.s32.totalorder %v836_v11, %v2023_v27  ;;  %vm870_vm9 = vcmp.eq.s32.totalorder %v836_v11, %v2032_v31 }
 0x1f0   : > { %vm902_vm15 = vmor %vm2301_vm11, %vm870_vm9  ;;  %vm650_vm11 = vcmp.eq.s32.totalorder %v618_v55, %v2032_v31  ;;  %vm568_vm9 = vcmp.eq.s32.totalorder %v2284_v2, %v2032_v31 }
 0x1f1   : > { %v1487_v13 = vsel %vm902_vm15, 1.0, %v1800_v43  ;;  %vm901_vm2 = vmor %vm789_vm0, %vm869_vm7 }
 0x1f2   : > { %vm1540_vm4 = vmpackc.low %vm901_vm2, %vm899_vm1  ;;  %v984_v14 = vpack.c.bf16 %v1487_v13, %v1485_v12  ;;  %vm648_vm1 = vcmp.eq.s32.totalorder %v615_v9, %v2032_v31  ;;  %v1755_v12 = vld [vmem:[%s242_s24] ss:$0 sm:$0xff]  ;;  %s1367_s24 = sshll.u32 %s1802_s21, 4  ;;  %s1368_s24 = int_to_ptr.vmem [resolvable:$true] %s1367_s24 }
 0x1f3   : > { %1541 = vmatmul.msk.bf16.vlgmr.msra.gmra.mxu3 %vm1540_vm4, %v1801_v48  ;;  %v1149_v15 = vpop.f32.mrf.mxu1  ;;  %vm679_vm15 = vmor %vm567_vm8, %vm647_vm12  ;;  %vm873_vm4 = vcmp.eq.s32.totalorder %v842_v21, %v2023_v27 }
 0x1f4   : > { %v1100_v16 = vpop.f32.mrf.mxu0  ;;  %1550 = vmatmul.msk.bf16.gmra.mxu1 %vm2402_vm14, %v984_v14 }
 0x1f5   : > { %v1150_v17 = vadd.f32 %v1149_v15, %v1100_v16 }
 0x1f7   : > { %v538_v19 = vpop.permute.xlu1 %537  ;;  %v2317_v20 = vpack.c.bf16 %v1150_v17, %v1148_v10  ;;  %v1191_v10 = vshrl.u32 %v456_v26, 7 }
 0x1f8   : > { %vm569_vm6 = vcmp.eq.s32.totalorder %v538_v19, %v2023_v27  ;;  %vm570_vm3 = vcmp.eq.s32.totalorder %v538_v19, %v2032_v31 }
 0x1f9   : > { %vm681_vm0 = vmor %vm569_vm6, %vm649_vm5  ;;  %vm874_vm5 = vcmp.eq.s32.totalorder %v842_v21, %v2032_v31  ;;  %v1192_v11 = vadd.s32 8, %v1191_v10  ;;  %v1193_v26 = vadd.s32 16, %v1191_v10  ;;  %v1194_v13 = vadd.s32 24, %v1191_v10 }
 0x1fa   : > { %vm682_vm7 = vmor %vm570_vm3, %vm650_vm11  ;;  %v1203_v14 = vadd.s32 96, %v1191_v10  ;;  %v1204_v15 = vadd.s32 104, %v1191_v10  ;;  %v1195_v16 = vadd.s32 32, %v1191_v10  ;;  %v1196_v17 = vadd.s32 40, %v1191_v10 }
 0x1fb   : > { %vm793_vm2 = vmor %vm681_vm0, %vm761_vm10  ;;  %v1206_v18 = vadd.s32 120, %v1191_v10  ;;  %v1197_v19 = vadd.s32 48, %v1191_v10  ;;  %v1199_v55 = vadd.s32 64, %v1191_v10  ;;  %v1201_v21 = vadd.s32 80, %v1191_v10 }
 0x1fc   : > { %vm794_vm14 = vmor %vm682_vm7, %vm762_vm13 }
 0x1fd   : > { %vm680_vm6 = vmor %vm568_vm9, %vm648_vm1 }
 0x1fe   : > { %vm2334_vm11 = vmor %vm793_vm2, %vm873_vm4  ;;  %vm1209_vm4 = vcmp.eq.s32.totalorder %v1755_v12, %v1191_v10 }
 0x1ff   : > { %vm906_vm12 = vmor %vm794_vm14, %vm874_vm5  ;;  %vm1210_vm14 = vcmp.eq.s32.totalorder %v1755_v12, %v1192_v11 }
 0x200   : > { %v727_v54 = vpop.permute.xlu1 %726  ;;  %v1491_v28 = vsel %vm906_vm12, 1.0, %v1800_v43  ;;  %vm1568_vm5 = vmpackc.low %vm1210_vm14, %vm1209_vm4  ;;  %vm1222_vm12 = vcmp.eq.s32.totalorder %v1755_v12, %v1204_v15 }
 0x201   : > { %vm759_vm3 = vcmp.eq.s32.totalorder %v727_v54, %v2023_v27  ;;  %vm760_vm8 = vcmp.eq.s32.totalorder %v727_v54, %v2032_v31  ;;  %v1200_v54 = vadd.s32 72, %v1191_v10 }
 0x202   : > { %vm791_vm10 = vmor %vm679_vm15, %vm759_vm3  ;;  %vm2405_vm15 = vcmask 130048   ;;  %vm1212_vm3 = vcmp.eq.s32.totalorder %v1755_v12, %v1194_v13 }
 0x203   : > { %vm792_vm0 = vmor %vm680_vm6, %vm760_vm8  ;;  %vm1211_vm6 = vcmp.eq.s32.totalorder %v1755_v12, %v1193_v26  ;;  %vm1221_vm8 = vcmp.eq.s32.totalorder %v1755_v12, %v1203_v14 }
 0x204   : > { %v1103_v59 = vpop.f32.mrf.mxu0 }
 0x205   : > { %v1152_v22 = vpop.f32.mrf.mxu1 }
 0x206   : > { %v1153_v23 = vadd.f32 %v1152_v22, %v1103_v59  ;;  %v1202_v59 = vadd.s32 88, %v1191_v10  ;;  %v1265_v22 = vld [vmem:[#allocation3] sm:$0xff] }
 0x209   : > { %v839_v25 = vpop.permute.xlu1 %838 }
 0x20a   : > { %vm871_vm7 = vcmp.eq.s32.totalorder %v839_v25, %v2023_v27  ;;  %vm872_vm13 = vcmp.eq.s32.totalorder %v839_v25, %v2032_v31  ;;  %v1266_v25 = vld [vmem:[#allocation3 + $0x8] sm:$0xff] }
 0x20b   : > { %vm903_vm1 = vmor %vm791_vm10, %vm871_vm7  ;;  %vm1214_vm7 = vcmp.eq.s32.totalorder %v1755_v12, %v1196_v17 }
 0x20c   : > { %vm904_vm9 = vmor %vm792_vm0, %vm872_vm13  ;;  %v1105_v30 = vpop.f32.mrf.mxu0  ;;  %vm1213_vm0 = vcmp.eq.s32.totalorder %v1755_v12, %v1195_v16 }
 0x20d   : > { %v1489_v29 = vsel %vm904_vm9, 1.0, %v1800_v43  ;;  %vm1542_vm2 = vmpackc.low %vm2334_vm11, %vm903_vm1  ;;  %v1154_v32 = vpop.f32.mrf.mxu1  ;;  %vm1224_vm9 = vcmp.eq.s32.totalorder %v1755_v12, %v1206_v18 }
 0x20e   : > { %v986_v33 = vpack.c.bf16 %v1491_v28, %v1489_v29  ;;  %1543 = vmatmul.msk.bf16.gmra.mxu3 %vm1542_vm2, %v1801_v48  ;;  %v1155_v34 = vadd.f32 %v1154_v32, %v1105_v30  ;;  %vm1570_vm11 = vmpackc.low %vm1212_vm3, %vm1211_vm6  ;;  %vm1218_vm6 = vcmp.eq.s32.totalorder %v1755_v12, %v1200_v54  ;;  %v1267_v30 = vld [vmem:[#allocation3 + $0x10] sm:$0xff] }
 0x20f   : > { %vm1580_vm10 = vmpackc.low %vm1222_vm12, %vm1221_vm8  ;;  %vm1220_vm8 = vcmp.eq.s32.totalorder %v1755_v12, %v1202_v59 }
 0x210   : > { %1551 = vmatmul.msk.bf16.gmra.mxu1 %vm2405_vm15, %v986_v33  ;;  %v1184_v27 = vpack.c.bf16 %v1155_v34, %v1153_v23  ;;  %vm1572_vm13 = vmpackc.low %vm1214_vm7, %vm1213_vm0  ;;  %vm1215_vm15 = vcmp.eq.s32.totalorder %v1755_v12, %v1197_v19  ;;  %v1268_v34 = vld [vmem:[#allocation3 + $0x18] sm:$0xff] }
 0x21f   : > { %v1108_v35 = vpop.f32.mrf.mxu0 }
 0x220   : > { %v1157_v31 = vpop.f32.mrf.mxu1 }
 0x221   : > { %v1158_v38 = vadd.f32 %v1157_v31, %v1108_v35  ;;  %v1277_v31 = vld [vmem:[#allocation3 + $0x60] sm:$0xff] }
 0x227   : > { %v1110_v36 = vpop.f32.mrf.mxu0 }
 0x228   : > { %v1159_v37 = vpop.f32.mrf.mxu1 }
 0x229   : > { %v1160_v39 = vadd.f32 %v1159_v37, %v1110_v36 }
 0x22b   : > { %v1185_v40 = vpack.c.bf16 %v1160_v39, %v1158_v38 }
 0x23a   : > { %v1113_v47 = vpop.f32.mrf.mxu0 }
 0x23b   : > { %v1162_v43 = vpop.f32.mrf.mxu1 }
 0x23c   : > { %v1163_v8 = vadd.f32 %v1162_v43, %v1113_v47 }
 0x242   : > { %v1115_v51 = vpop.f32.mrf.mxu0 }
 0x243   : > { %v1164_v41 = vpop.f32.mrf.mxu1 }
 0x244   : > { %v1165_v6 = vadd.f32 %v1164_v41, %v1115_v51 }
 0x246   : > { %v1186_v9 = vpack.c.bf16 %v1165_v6, %v1163_v8  ;;  %v1276_v8 = vld [vmem:[#allocation3 + $0x58] sm:$0xff] }
 0x255   : > { %v1118_v56 = vpop.f32.mrf.mxu0 }
 0x256   : > { %v1167_v42 = vpop.f32.mrf.mxu1 }
 0x257   : > { %v1168_v5 = vadd.f32 %v1167_v42, %v1118_v56  ;;  %v1270_v42 = vld [vmem:[#allocation3 + $0x28] sm:$0xff] }
 0x25d   : > { %v1120_v2 = vpop.f32.mrf.mxu0 }
 0x25e   : > { %v1169_v44 = vpop.f32.mrf.mxu1 }
 0x25f   : > { %v1170_v3 = vadd.f32 %v1169_v44, %v1120_v2  ;;  %v1274_v2 = vld [vmem:[#allocation3 + $0x48] sm:$0xff] }
 0x261   : > { %v1187_v7 = vpack.c.bf16 %v1170_v3, %v1168_v5  ;;  %v1275_v5 = vld [vmem:[#allocation3 + $0x50] sm:$0xff] }
 0x271   : > { %v1172_v45 = vpop.f32.mrf.mxu1 }
 0x276   : > { %v1123_v46 = vpop.f32.mrf.mxu3 }
 0x277   : > { %v1173_v1 = vadd.f32 %v1172_v45, %v1123_v46  ;;  %v1279_v46 = vld [vmem:[#allocation3 + $0x70] sm:$0xff] }
 0x279   : > { %v1174_v49 = vpop.f32.mrf.mxu1 }
 0x27e   : > { %v1125_v50 = vpop.f32.mrf.mxu3 }
 0x27f   : > { %v1175_v62 = vadd.f32 %v1174_v49, %v1125_v50  ;;  %v1271_v50 = vld [vmem:[#allocation3 + $0x30] sm:$0xff] }
 0x281   : > { %v1188_v4 = vpack.c.bf16 %v1175_v62, %v1173_v1  ;;  %v1273_v62 = vld [vmem:[#allocation3 + $0x40] sm:$0xff] }
 0x28d   : > { %v1177_v52 = vpop.f32.mrf.mxu1 }
 0x291   : > { %v1128_v53 = vpop.f32.mrf.mxu3 }
 0x292   : > { %v1178_v60 = vadd.f32 %v1177_v52, %v1128_v53  ;;  %v1280_v53 = vld [vmem:[#allocation3 + $0x78] sm:$0xff] }
 0x295   : > { %v1179_v57 = vpop.f32.mrf.mxu1 }
 0x299   : > { %v1130_v58 = vpop.f32.mrf.mxu3 }
 0x29a   : > { %v1180_v61 = vadd.f32 %v1179_v57, %v1130_v58  ;;  %v1272_v58 = vld [vmem:[#allocation3 + $0x38] sm:$0xff] }
 0x29c   : > { %v1189_v0 = vpack.c.bf16 %v1180_v61, %v1178_v60 }
 0x29e   : > { %1281 = vmatpush.bf16.msra.mxu2 %v1189_v0  ;;  %1676 = vmatpush.bf16.msrb.mxu3 %v1189_v0 }
 0x2a2   : > { %1282 = vmatpush.bf16.msra.mxu2 %v1188_v4  ;;  %1677 = vmatpush.bf16.msrb.mxu3 %v1188_v4 }
 0x2a6   : > { %1283 = vmatpush.bf16.msra.mxu2 %v1187_v7  ;;  %1678 = vmatpush.bf16.msrb.mxu3 %v1187_v7 }
 0x2aa   : > { %1284 = vmatpush.bf16.msra.mxu2 %v1186_v9  ;;  %1679 = vmatpush.bf16.msrb.mxu3 %v1186_v9 }
 0x2ae   : > { %1285 = vmatpush.bf16.msra.mxu2 %v1185_v40  ;;  %1680 = vmatpush.bf16.msrb.mxu3 %v1185_v40  ;;  %v1278_v40 = vld [vmem:[#allocation3 + $0x68] sm:$0xff] }
 0x2b2   : > { %1286 = vmatpush.bf16.msra.mxu2 %v1184_v27  ;;  %1681 = vmatpush.bf16.msrb.mxu3 %v1184_v27 }
 0x2b6   : > { %1287 = vmatpush.bf16.msra.mxu2 %v2317_v20  ;;  %1682 = vmatpush.bf16.msrb.mxu3 %v2317_v20  ;;  %v1198_v20 = vadd.s32 56, %v1191_v10 }
 0x2b8   : > { %vm1216_vm4 = vcmp.eq.s32.totalorder %v1755_v12, %v1198_v20 }
 0x2b9   : > { %vm1574_vm14 = vmpackc.low %vm1216_vm4, %vm1215_vm15 }
 0x2ba   : > { %1288 = vmatpush.bf16.msra.mxu2 %v2281_v63  ;;  %1683 = vmatpush.bf16.msrb.mxu3 %v2281_v63  ;;  %v1205_v63 = vadd.s32 112, %v1191_v10 }
 0x2bc   : > { %vm1223_vm1 = vcmp.eq.s32.totalorder %v1755_v12, %v1205_v63 }
 0x2bd   : > { %1569 = vmatmul.msk.bf16.vlgmr.msra.gmra.mxu2 %vm1568_vm5, %v1801_v48  ;;  %1581 = vmatmul.msk.bf16.vlgmr.msrb.gmra.mxu3 %vm1580_vm10, %v1801_v48  ;;  %vm1582_vm2 = vmpackc.low %vm1224_vm9, %vm1223_vm1  ;;  %vm1217_vm5 = vcmp.eq.s32.totalorder %v1755_v12, %v1199_v55 }
 0x2be   : > { %vm1576_vm3 = vmpackc.low %vm1218_vm6, %vm1217_vm5 }
 0x2cd   : > { %1571 = vmatmul.msk.bf16.gmra.mxu2 %vm1570_vm11, %v1801_v48  ;;  %1583 = vmatmul.msk.bf16.gmra.mxu3 %vm1582_vm2, %v1801_v48  ;;  %vm1219_vm11 = vcmp.eq.s32.totalorder %v1755_v12, %v1201_v21 }
 0x2ce   : > { %vm1578_vm12 = vmpackc.low %vm1220_vm8, %vm1219_vm11 }
 0x2dd   : > { %1573 = vmatmul.msk.bf16.gmra.mxu2 %vm1572_vm13, %v1801_v48 }
 0x2ed   : > { %1575 = vmatmul.msk.bf16.gmra.mxu2 %vm1574_vm14, %v1801_v48 }
 0x2fd   : > { %1577 = vmatmul.msk.bf16.gmra.mxu2 %vm1576_vm3, %v1801_v48 }
 0x30d   : > { %1579 = vmatmul.msk.bf16.gmra.mxu2 %vm1578_vm12, %v1801_v48  ;;  %v1269_v48 = vld [vmem:[#allocation3 + $0x20] sm:$0xff] }
 0x340   : > { %v1290_v23 = vpop.f32.mrf.mxu2  ;;  %v1320_v36 = vpop.f32.mrf.mxu3 }
 0x341   : > { %v1330_v24 = vadd.f32 %v1290_v23, %v1265_v22  ;;  %v1342_v37 = vadd.f32 %v1320_v36, %v1277_v31 }
 0x343   : > { %1346 = vst [vmem:[#allocation3] sm:$0xff] %v1330_v24 }
 0x344   : > { %1358 = vst [vmem:[#allocation3 + $0x60] sm:$0xff] %v1342_v37 }
 0x348   : > { %v1292_v28 = vpop.f32.mrf.mxu2  ;;  %v1322_v43 = vpop.f32.mrf.mxu3 }
 0x349   : > { %v1331_v29 = vadd.f32 %v1292_v28, %v1266_v25  ;;  %v1343_v41 = vadd.f32 %v1322_v43, %v1278_v40 }
 0x34b   : > { %1347 = vst [vmem:[#allocation3 + $0x8] sm:$0xff] %v1331_v29 }
 0x34c   : > { %1359 = vst [vmem:[#allocation3 + $0x68] sm:$0xff] %v1343_v41 }
 0x350   : > { %v1295_v32 = vpop.f32.mrf.mxu2  ;;  %v1325_v47 = vpop.f32.mrf.mxu3 }
 0x351   : > { %v1332_v33 = vadd.f32 %v1295_v32, %v1267_v30  ;;  %v1344_v49 = vadd.f32 %v1325_v47, %v1279_v46 }
 0x353   : > { %1348 = vst [vmem:[#allocation3 + $0x10] sm:$0xff] %v1332_v33 }
 0x354   : > { %1360 = vst [vmem:[#allocation3 + $0x70] sm:$0xff] %v1344_v49 }
 0x358   : > { %v1297_v27 = vpop.f32.mrf.mxu2  ;;  %v1327_v56 = vpop.f32.mrf.mxu3 }
 0x359   : > { %v1333_v35 = vadd.f32 %v1297_v27, %v1268_v34  ;;  %v1345_v57 = vadd.f32 %v1327_v56, %v1280_v53 }
 0x35b   : > { %1349 = vst [vmem:[#allocation3 + $0x18] sm:$0xff] %v1333_v35 }
 0x35c   : > { %1361 = vst [vmem:[#allocation3 + $0x78] sm:$0xff] %v1345_v57 }
 0x360   : > { %v1300_v38 = vpop.f32.mrf.mxu2 }
 0x361   : > { %v1334_v39 = vadd.f32 %v1300_v38, %v1269_v48 }
 0x363   : > { %1350 = vst [vmem:[#allocation3 + $0x20] sm:$0xff] %v1334_v39 }
 0x368   : > { %v1302_v44 = vpop.f32.mrf.mxu2 }
 0x369   : > { %v1335_v45 = vadd.f32 %v1302_v44, %v1270_v42 }
 0x36b   : > { %1351 = vst [vmem:[#allocation3 + $0x28] sm:$0xff] %v1335_v45 }
 0x370   : > { %v1305_v51 = vpop.f32.mrf.mxu2 }
 0x371   : > { %v1336_v52 = vadd.f32 %v1305_v51, %v1271_v50 }
 0x373   : > { %1352 = vst [vmem:[#allocation3 + $0x30] sm:$0xff] %v1336_v52 }
 0x378   : > { %v1307_v60 = vpop.f32.mrf.mxu2 }
 0x379   : > { %v1337_v61 = vadd.f32 %v1307_v60, %v1272_v58 }
 0x37b   : > { %1353 = vst [vmem:[#allocation3 + $0x38] sm:$0xff] %v1337_v61 }
 0x380   : > { %v1310_v0 = vpop.f32.mrf.mxu2 }
 0x381   : > { %v1338_v1 = vadd.f32 %v1310_v0, %v1273_v62 }
 0x383   : > { %1354 = vst [vmem:[#allocation3 + $0x40] sm:$0xff] %v1338_v1 }
 0x388   : > { %v1312_v3 = vpop.f32.mrf.mxu2 }
 0x389   : > { %v1339_v4 = vadd.f32 %v1312_v3, %v1274_v2 }
 0x38b   : > { %1355 = vst [vmem:[#allocation3 + $0x48] sm:$0xff] %v1339_v4 }
 0x390   : > { %v1315_v6 = vpop.f32.mrf.mxu2 }
 0x391   : > { %v1340_v7 = vadd.f32 %v1315_v6, %v1275_v5 }
 0x393   : > { %1356 = vst [vmem:[#allocation3 + $0x50] sm:$0xff] %v1340_v7 }
 0x398   : > { %v1317_v9 = vpop.f32.mrf.mxu2 }
 0x399   : > { %v1341_v10 = vadd.f32 %v1317_v9, %v1276_v8 }
 0x39b   : > { %1357 = vst [vmem:[#allocation3 + $0x58] sm:$0xff] %v1341_v10 }
 0x39c   : > { %1685 = dma.vmem_to_hbm [thread:$0]  (%p1688_p6), %s1368_s24, 2048, %s1370_s22, [#allocation4], %s1803_s23, %s1803_s23, %s1804_s25  }
 0x39d   : > { %1789 = dma.done.wait (%p1688_p6), [#allocation4], 2048  }
 0x39e   : > { %1791 = vsyncadd (%p1688_p6), [#allocation4], 4294965248 }
 0x39f PF: > { %s16_s18 = sadd.s32 1, %s1794_s18  }
 0x3a0   : > { %p13_p7 = scmp.ge.s32.totalorder %s16_s18, 4  }
 0x3a2   :  { %15 = sbr.rel (!%p13_p7) target bundleno = 1 (0x1), region = 77 }
 0x3a7   :  { %1386 = vsyncpa [#allocation4], 1 }
 0x3a8   :  { %1388 = vsyncpa [#allocation4 + $0x1], 1 }

</bundles_post_ra>
